<compile_context>
chip_gen: v7x
topology: tpu7x:2x2x1
jax: 0.10.0
libtpu: 0.0.40
codegen_flags: <defaults>
</compile_context>

<pallas_src>
import functools

import jax
import jax.numpy as jnp
import numpy as np
from jax.experimental import pallas as pl
from jax.experimental.pallas import tpu as pltpu

DROPOUT = 0.2
N_EMBD = 384


def ffn_kernel(seed_ref, x_ref, w1_ref, b1_ref, w2_ref, b2_ref, o_ref,
               *, dropout_rate, apply_dropout, compute_dtype):
    # x_ref: (tm, D), w1_ref: (D, H), b1_ref: (1, H), w2_ref: (H, D),
    # b2_ref: (1, D), o_ref: (tm, D)
    x = x_ref[...].astype(compute_dtype)

    # Linear 1 + ReLU  (MXU matmul in bf16, f32 accumulate; VPU epilogue in f32)
    h = jnp.dot(x, w1_ref[...], preferred_element_type=jnp.float32)
    h = jnp.maximum(h + b1_ref[...], 0.0)

    # Linear 2
    y = jnp.dot(h.astype(compute_dtype), w2_ref[...],
                preferred_element_type=jnp.float32) + b2_ref[...]

    if apply_dropout:
        # Inverted dropout (training semantics): keep with prob (1-p), scale
        # kept values by 1/(1-p).  Counter-based hash PRNG keyed on
        # (seed, global element index) -> pure uint32 VPU ops, free under an
        # MXU-bound kernel, portable to interpret mode, tile-size invariant.
        # NOTE: random stream differs from torch's RNG (same Bernoulli law).
        tm, d = y.shape
        row = jax.lax.broadcasted_iota(jnp.uint32, (tm, d), 0)
        col = jax.lax.broadcasted_iota(jnp.uint32, (tm, d), 1)
        grow = pl.program_id(0).astype(jnp.uint32) * np.uint32(tm) + row
        bits = grow * np.uint32(d) + col
        bits = bits ^ (seed_ref[0].astype(jnp.uint32) * np.uint32(0x9E3779B9))
        # lowbias32 integer mixer.
        bits = bits ^ (bits >> 16)
        bits = bits * np.uint32(0x7FEB352D)
        bits = bits ^ (bits >> 15)
        bits = bits * np.uint32(0x846CA68B)
        bits = bits ^ (bits >> 16)
        threshold = np.uint32(int(dropout_rate * 4294967296.0))
        keep = bits >= threshold
        y = jnp.where(keep, y * np.float32(1.0 / (1.0 - dropout_rate)),
                      np.float32(0.0))

    o_ref[...] = y.astype(o_ref.dtype)


def _pick_tm(m, requested):
    """Largest tile <= requested that is a multiple of 8 and divides m."""
    tm = max(8, min(requested, m))
    tm = min(tm, m)
    while tm > 8 and m % tm != 0:
        tm -= 8
    if m % tm != 0:
        tm = m
    return tm


def feed_forward(x, w1, b1, w2, b2, *, seed=0, dropout_rate=DROPOUT,
                 training=True, tm=256, compute_dtype=jnp.bfloat16,
                 vmem_limit_bytes=48 * 1024 * 1024):
    """x: (B, T, D).  Returns (B, T, D) in x.dtype."""
    B, T, D = x.shape
    H = w1.shape[1]
    M = B * T
    tm = _pick_tm(M, tm)

    x2d = x.reshape(M, D).astype(compute_dtype)    # halve activation DMA bytes
    w1c = w1.astype(compute_dtype)                 # cast weights once, outside
    w2c = w2.astype(compute_dtype)
    b1_2d = b1.reshape(1, H).astype(jnp.float32)
    b2_2d = b2.reshape(1, D).astype(jnp.float32)
    seed_arr = jnp.array([seed], dtype=jnp.int32)

    kernel = functools.partial(
        ffn_kernel,
        dropout_rate=float(dropout_rate),
        apply_dropout=bool(training) and dropout_rate > 0.0,
        compute_dtype=compute_dtype)

    # Weights/biases have a constant index_map -> single-buffer them so they
    # don't pay 2x VMEM for nothing (matters most on v7x's 64 MiB VMEM).
    w_kwargs = {}
    if hasattr(pl, "Buffered"):
        w_kwargs = dict(pipeline_mode=pl.Buffered(1))

    out2d = pl.pallas_call(
        kernel,
        out_shape=jax.ShapeDtypeStruct((M, D), x.dtype),
        grid_spec=pltpu.PrefetchScalarGridSpec(
            num_scalar_prefetch=1,
            grid=(M // tm,),
            in_specs=[
                pl.BlockSpec((tm, D), lambda i, seed: (i, 0)),              # x tile
                pl.BlockSpec((D, H), lambda i, seed: (0, 0), **w_kwargs),   # w1 (resident)
                pl.BlockSpec((1, H), lambda i, seed: (0, 0), **w_kwargs),   # b1
                pl.BlockSpec((H, D), lambda i, seed: (0, 0), **w_kwargs),   # w2 (resident)
                pl.BlockSpec((1, D), lambda i, seed: (0, 0), **w_kwargs),   # b2
            ],
            out_specs=pl.BlockSpec((tm, D), lambda i, seed: (i, 0)),
        ),
        compiler_params=pltpu.CompilerParams(
            # Token axis has no cross-step dependence: lets v7x shard it over
            # its 2 TensorCores (neutral on v5e/v6e).
            dimension_semantics=("parallel",),
            # Scoped-VMEM default (16/32 MiB) is too small for larger tm +
            # resident weights; 48 MiB is safe on every generation.
            vmem_limit_bytes=vmem_limit_bytes,
        ),
    )(seed_arr, x2d, w1c, b1_2d, w2c, b2_2d)

    return out2d.reshape(B, T, D)


def init_params(key, n_embd, hidden):
    # Deterministic init mimicking torch.nn.Linear default U[-1/sqrt(fan_in), ...].
    k1, k2, k3, k4 = jax.random.split(key, 4)
    lim1 = 1.0 / float(np.sqrt(n_embd))
    lim2 = 1.0 / float(np.sqrt(hidden))
    w1 = jax.random.uniform(k1, (n_embd, hidden), jnp.float32, -lim1, lim1)
    b1 = jax.random.uniform(k2, (hidden,), jnp.float32, -lim1, lim1)
    w2 = jax.random.uniform(k3, (hidden, n_embd), jnp.float32, -lim2, lim2)
    b2 = jax.random.uniform(k4, (n_embd,), jnp.float32, -lim2, lim2)
    return w1, b1, w2, b2


if __name__ == "__main__":
    # Small shapes consistent with the module: n_embd=384, hidden=4*n_embd.
    B, T, D = 2, 8, N_EMBD
    H = 4 * D

    key = jax.random.PRNGKey(0)
    kx, kp = jax.random.split(key)
    x = jax.random.normal(kx, (B, T, D), dtype=jnp.float32)
    w1, b1, w2, b2 = init_params(kp, D, H)

    # Eval path (dropout off): deterministic; compare against a pure-JAX
    # reference that uses the same bf16-matmul / f32-accumulate recipe.
    out_eval = jax.block_until_ready(
        feed_forward(x, w1, b1, w2, b2, training=False))
    xb = x.reshape(-1, D).astype(jnp.bfloat16)
    h_ref = jnp.maximum(
        jnp.dot(xb, w1.astype(jnp.bfloat16),
                preferred_element_type=jnp.float32) + b1, 0.0)
    ref = jnp.dot(h_ref.astype(jnp.bfloat16), w2.astype(jnp.bfloat16),
                  preferred_element_type=jnp.float32) + b2
    assert out_eval.shape == (B, T, D)
    assert jnp.allclose(out_eval.reshape(-1, D), ref, atol=1e-2, rtol=1e-2), (
        float(jnp.max(jnp.abs(out_eval.reshape(-1, D) - ref))))

    # Training path (dropout on): check shape and that roughly `dropout`
    # fraction of the outputs got zeroed.
    out_train = jax.block_until_ready(
        feed_forward(x, w1, b1, w2, b2, seed=1234, training=True))
    assert out_train.shape == (B, T, D)
    zero_frac = float(jnp.mean(out_train == 0.0))
    assert 0.1 < zero_frac < 0.3, zero_frac

    print("KERNEL_OK")
</pallas_src>

<mosaic_0001>
module attributes {stable_mosaic.version = 11 : i64} {
  func.func @ffn_kernel(%arg0: i32, %arg1: memref<1xi32, #tpu.memory_space<smem>>, %arg2: memref<16x384xbf16, #tpu.memory_space<vmem>>, %arg3: memref<384x1536xbf16, #tpu.memory_space<vmem>>, %arg4: memref<1x1536xf32, #tpu.memory_space<vmem>>, %arg5: memref<1536x384xbf16, #tpu.memory_space<vmem>>, %arg6: memref<1x384xf32, #tpu.memory_space<vmem>>, %arg7: memref<16x384xf32, #tpu.memory_space<vmem>>) attributes {dimension_semantics = [#tpu.dimension_semantics<parallel>], iteration_bounds = array<i64: 1>, scalar_prefetch = 1 : i64, scratch_operands = 0 : i64, tpu.core_type = #tpu.core_type<tc>, window_params = [{transform_indices = @transform_0, window_bounds = array<i64: 16, 384>}, {pipeline_mode = #tpu.pipeline_mode<synchronous>, transform_indices = @transform_1, window_bounds = array<i64: 384, 1536>}, {pipeline_mode = #tpu.pipeline_mode<synchronous>, transform_indices = @transform_2, window_bounds = array<i64: 1, 1536>}, {pipeline_mode = #tpu.pipeline_mode<synchronous>, transform_indices = @transform_3, window_bounds = array<i64: 1536, 384>}, {pipeline_mode = #tpu.pipeline_mode<synchronous>, transform_indices = @transform_4, window_bounds = array<i64: 1, 384>}, {transform_indices = @transform_5, window_bounds = array<i64: 16, 384>}]} {
    %c0 = arith.constant 0 : index
    %c0_0 = arith.constant 0 : index
    %0 = vector.load %arg2[%c0, %c0_0] : memref<16x384xbf16, #tpu.memory_space<vmem>>, vector<16x384xbf16>
    %c0_1 = arith.constant 0 : index
    %c0_2 = arith.constant 0 : index
    %1 = vector.load %arg3[%c0_1, %c0_2] : memref<384x1536xbf16, #tpu.memory_space<vmem>>, vector<384x1536xbf16>
    %cst = arith.constant dense<0.000000e+00> : vector<16x1536xf32>
    %2 = tpu.matmul %0, %1, %cst {dimension_numbers = #tpu.dot_dimension_numbers<[1], [0], [0], [1], [0, 0, 1, 1], [], []>} : vector<16x384xbf16>, vector<384x1536xbf16>, vector<16x1536xf32> -> vector<16x1536xf32>
    %c0_3 = arith.constant 0 : index
    %c0_4 = arith.constant 0 : index
    %3 = vector.load %arg4[%c0_3, %c0_4] : memref<1x1536xf32, #tpu.memory_space<vmem>>, vector<1x1536xf32>
    %4 = vector.broadcast %3 : vector<1x1536xf32> to vector<16x1536xf32>
    %5 = arith.addf %2, %4 : vector<16x1536xf32>
    %cst_5 = arith.constant 0.000000e+00 : f32
    %6 = vector.broadcast %cst_5 : f32 to vector<16x1536xf32>
    %7 = arith.maximumf %5, %6 : vector<16x1536xf32>
    %8 = arith.truncf %7 : vector<16x1536xf32> to vector<16x1536xbf16>
    %c0_6 = arith.constant 0 : index
    %c0_7 = arith.constant 0 : index
    %9 = vector.load %arg5[%c0_6, %c0_7] : memref<1536x384xbf16, #tpu.memory_space<vmem>>, vector<1536x384xbf16>
    %cst_8 = arith.constant dense<0.000000e+00> : vector<16x384xf32>
    %10 = tpu.matmul %8, %9, %cst_8 {dimension_numbers = #tpu.dot_dimension_numbers<[1], [0], [0], [1], [0, 0, 1, 1], [], []>} : vector<16x1536xbf16>, vector<1536x384xbf16>, vector<16x384xf32> -> vector<16x384xf32>
    %c0_9 = arith.constant 0 : index
    %c0_10 = arith.constant 0 : index
    %11 = vector.load %arg6[%c0_9, %c0_10] : memref<1x384xf32, #tpu.memory_space<vmem>>, vector<1x384xf32>
    %12 = vector.broadcast %11 : vector<1x384xf32> to vector<16x384xf32>
    %13 = arith.addf %10, %12 : vector<16x384xf32>
    %c0_11 = arith.constant 0 : index
    %c0_12 = arith.constant 0 : index
    %14 = vector.load %arg7[%c0_11, %c0_12] : memref<16x384xf32, #tpu.memory_space<vmem>>, vector<16x384xf32>
    tpu.vector_store %arg7[%c0_11, %c0_12], %13 {strides = array<i32>} : memref<16x384xf32, #tpu.memory_space<vmem>>, vector<16x384xf32>,
    return
  }
  func.func @transform_0(%arg0: i32, %arg1: memref<1xi32, #tpu.memory_space<smem>>) -> (i32, i32) {
    %c0_i32 = arith.constant 0 : i32
    %c0_i32_0 = arith.constant 0 : i32
    return %arg0, %c0_i32 : i32, i32
  }
  func.func @transform_1(%arg0: i32, %arg1: memref<1xi32, #tpu.memory_space<smem>>) -> (i32, i32) {
    %c0_i32 = arith.constant 0 : i32
    %c0_i32_0 = arith.constant 0 : i32
    %c0_i32_1 = arith.constant 0 : i32
    return %c0_i32, %c0_i32_0 : i32, i32
  }
  func.func @transform_2(%arg0: i32, %arg1: memref<1xi32, #tpu.memory_space<smem>>) -> (i32, i32) {
    %c0_i32 = arith.constant 0 : i32
    %c0_i32_0 = arith.constant 0 : i32
    %c0_i32_1 = arith.constant 0 : i32
    return %c0_i32, %c0_i32_0 : i32, i32
  }
  func.func @transform_3(%arg0: i32, %arg1: memref<1xi32, #tpu.memory_space<smem>>) -> (i32, i32) {
    %c0_i32 = arith.constant 0 : i32
    %c0_i32_0 = arith.constant 0 : i32
    %c0_i32_1 = arith.constant 0 : i32
    return %c0_i32, %c0_i32_0 : i32, i32
  }
  func.func @transform_4(%arg0: i32, %arg1: memref<1xi32, #tpu.memory_space<smem>>) -> (i32, i32) {
    %c0_i32 = arith.constant 0 : i32
    %c0_i32_0 = arith.constant 0 : i32
    %c0_i32_1 = arith.constant 0 : i32
    return %c0_i32, %c0_i32_0 : i32, i32
  }
  func.func @transform_5(%arg0: i32, %arg1: memref<1xi32, #tpu.memory_space<smem>>) -> (i32, i32) {
    %c0_i32 = arith.constant 0 : i32
    %c0_i32_0 = arith.constant 0 : i32
    return %arg0, %c0_i32 : i32, i32
  }
}

</mosaic_0001>

<bundles_post_ra>
// kernel: tpu_custom_call.1
= control target key start
LH: loop header
LB: loop body
LE: loop exit
PB: predicated region body
PF: predicated region fallthrough
CT: control target
= control target key end

     0   :  { %12 = vsyncpa [#allocation5], 0  ;;  %s6913_s0 = inlined_call_operand.<no memory space> [shape: s32[1], index: 0, kind: input, shape index: {}]   ;;  %s6914_s1 = inlined_call_operand.hbm [shape: bf16[16,384], index: 1, kind: input, shape index: {}]   ;;  %s6915_s2 = inlined_call_operand.hbm [shape: bf16[384,1536], index: 2, kind: input, shape index: {}]   ;;  %s6916_s3 = inlined_call_operand.hbm [shape: f32[1,1536], index: 3, kind: input, shape index: {}]   ;;  %s6917_s4 = inlined_call_operand.hbm [shape: bf16[1536,384], index: 4, kind: input, shape index: {}]   ;;  %s6918_s5 = inlined_call_operand.hbm [shape: f32[1,384], index: 5, kind: input, shape index: {}]   ;;  %s6919_s6 = inlined_call_operand.hbm [shape: f32[16,384], index: 6, kind: output, shape index: {}]  }
   0x1   :  { %13 = vsyncpa [#allocation8], 0 }
   0x2   :  { %14 = vsyncpa [#allocation11], 0 }
   0x3   :  { %15 = vsyncpa [#allocation6], 0  ;;  %s6678_s0 = smov [#allocation7]   ;;  %s6538_s24 = scalar_lea.hbm %s6915_s2, 36864 }
   0x4   :  { %s33_s21 = sshll.u32 %s6678_s0, 4  ;;  %p6539_p0 = scmp.ne.s32.totalorder %s6915_s2, %s6538_s24  ;;  %s34_s21 = int_to_ptr.vmem [resolvable:$true] %s33_s21 }
   0x5   :  { %p6542_p1 = scmp.lt.u32.totalorder %s6538_s24, %s6915_s2 }
   0x7   :  { %p6544_p2 = pnand %p6542_p1, %p6539_p0 }
   0x9   :  { %6547 = shalt.err (!%p6544_p2)
}
   0xa   :  { %s6548_s29 = scalar_lea.vmem %s34_s21, 36864  ;;  %p6553_p4 = scmp.lt.s32.totalorder %s34_s21, %s34_s21 }
   0xb   :  { %p6549_p3 = scmp.ne.s32.totalorder %s34_s21, %s6548_s29  ;;  %p6554_p5 = scmp.lt.s32.totalorder %s6548_s29, %s6548_s29 }
   0xd   :  { %p6555_p6 = por %p6554_p5, %p6553_p4 }
   0xf   :  { %p6556_p7 = pnand %p6555_p6, %p6549_p3 }
  0x11   :  { %6559 = shalt.err (!%p6556_p7)
}
  0x12   :  { %s6679_s30 = smov 768   ;;  %s6680_s7 = smov 48  }
  0x13   :  { %39 = dma.hbm_to_vmem [thread:$0]  %s6915_s2, 36864, %s34_s21, [#allocation8], %s6679_s30, %s6679_s30, %s6680_s7  }
  0x14   :  { %s6681_s10 = smov [#allocation10]   ;;  %s6682_s12 = smov [#allocation4]  }
  0x15   :  { %s55_s11 = sshll.u32 %s6681_s10, 4  ;;  %s21_s13 = sshll.u32 %s6682_s12, 4  ;;  %s56_s11 = int_to_ptr.vmem [resolvable:$true] %s55_s11  ;;  %s22_s13 = int_to_ptr.vmem [resolvable:$true] %s21_s13 }
  0x16   :  { %s6560_s16 = scalar_lea.hbm %s6917_s4, 36864 }
  0x17   :  { %p6561_p8 = scmp.ne.s32.totalorder %s6917_s4, %s6560_s16  ;;  %p6564_p9 = scmp.lt.u32.totalorder %s6560_s16, %s6917_s4 }
  0x19   :  { %p6566_p10 = pnand %p6564_p9, %p6561_p8 }
  0x1b   :  { %6569 = shalt.err (!%p6566_p10)
}
  0x1c   :  { %s6570_s2 = scalar_lea.vmem %s56_s11, 36864  ;;  %p6575_p12 = scmp.lt.s32.totalorder %s56_s11, %s56_s11 }
  0x1d   :  { %p6571_p11 = scmp.ne.s32.totalorder %s56_s11, %s6570_s2  ;;  %p6576_p13 = scmp.lt.s32.totalorder %s6570_s2, %s6570_s2 }
  0x1f   :  { %p6577_p0 = por %p6576_p13, %p6575_p12 }
  0x21   :  { %p6578_p1 = pnand %p6577_p0, %p6571_p11 }
  0x23   :  { %6581 = shalt.err (!%p6578_p1)
}
  0x24   :  { %s6683_s0 = smov 192   ;;  %s6684_s21 = smov 12  }
  0x25   :  { %61 = dma.hbm_to_vmem [thread:$0]  %s6917_s4, 36864, %s56_s11, [#allocation11], %s6683_s0, %s6683_s0, %s6684_s21  }
  0x26   :  { %s6582_s26 = scalar_lea.hbm %s6914_s1, 384 }
  0x27   :  { %p6583_p2 = scmp.ne.s32.totalorder %s6914_s1, %s6582_s26  ;;  %p6586_p3 = scmp.lt.u32.totalorder %s6582_s26, %s6914_s1 }
  0x29   :  { %p6588_p4 = pnand %p6586_p3, %p6583_p2 }
  0x2b   :  { %6591 = shalt.err (!%p6588_p4)
}
  0x2c   :  { %s6592_s7 = scalar_lea.vmem %s22_s13, 384  ;;  %p6597_p6 = scmp.lt.s32.totalorder %s22_s13, %s22_s13 }
  0x2d   :  { %p6593_p5 = scmp.ne.s32.totalorder %s22_s13, %s6592_s7  ;;  %p6598_p7 = scmp.lt.s32.totalorder %s6592_s7, %s6592_s7 }
  0x2f   :  { %p6599_p8 = por %p6598_p7, %p6597_p6 }
  0x31   :  { %p6600_p9 = pnand %p6599_p8, %p6593_p5 }
  0x33   :  { %6603 = shalt.err (!%p6600_p9)
}
  0x34   :  { %27 = dma.hbm_to_vmem [thread:$0]  %s6914_s1, 384, %s22_s13, [#allocation5], %s6683_s0, %s6683_s0, %s6684_s21  }
  0x35   :  { %s6685_s9 = smov [#allocation9]   ;;  %s6686_s11 = smov [#allocation12]  }
  0x36   :  { %s46_s10 = sshll.u32 %s6685_s9, 4  ;;  %s68_s12 = sshll.u32 %s6686_s11, 4  ;;  %s47_s10 = int_to_ptr.vmem [resolvable:$true] %s46_s10  ;;  %s69_s12 = int_to_ptr.vmem [resolvable:$true] %s68_s12 }
  0x37   :  { %s6604_s16 = scalar_lea.hbm %s6916_s3, 192 }
  0x38   :  { %p6605_p10 = scmp.ne.s32.totalorder %s6916_s3, %s6604_s16  ;;  %p6608_p11 = scmp.lt.u32.totalorder %s6604_s16, %s6916_s3 }
  0x3a   :  { %p6610_p12 = pnand %p6608_p11, %p6605_p10 }
  0x3c   :  { %6613 = shalt.err (!%p6610_p12)
}
  0x3d   :  { %s6614_s1 = scalar_lea.vmem %s47_s10, 192  ;;  %p6619_p0 = scmp.lt.s32.totalorder %s47_s10, %s47_s10 }
  0x3e   :  { %p6615_p13 = scmp.ne.s32.totalorder %s47_s10, %s6614_s1  ;;  %p6620_p1 = scmp.lt.s32.totalorder %s6614_s1, %s6614_s1 }
  0x40   :  { %p6621_p2 = por %p6620_p1, %p6619_p0 }
  0x42   :  { %p6622_p3 = pnand %p6621_p2, %p6615_p13 }
  0x44   :  { %6625 = shalt.err (!%p6622_p3)
}
  0x45   :  { %49 = dma.hbm_to_vmem [thread:$0]  %s6916_s3, 192, %s47_s10, [#allocation8]  }
  0x46   :  { %s6626_s22 = scalar_lea.hbm %s6918_s5, 48 }
  0x47   :  { %p6627_p4 = scmp.ne.s32.totalorder %s6918_s5, %s6626_s22  ;;  %p6630_p5 = scmp.lt.u32.totalorder %s6626_s22, %s6918_s5 }
  0x49   :  { %p6632_p6 = pnand %p6630_p5, %p6627_p4 }
  0x4b   :  { %6635 = shalt.err (!%p6632_p6)
}
  0x4c   :  { %s6636_s27 = scalar_lea.vmem %s69_s12, 48  ;;  %s6640_s28 = scalar_lea.vmem %s69_s12, 64 }
  0x4d   :  { %p6637_p7 = scmp.ne.s32.totalorder %s69_s12, %s6636_s27  ;;  %p6641_p8 = scmp.lt.s32.totalorder %s69_s12, %s69_s12 }
  0x4e   :  { %p6642_p9 = scmp.lt.s32.totalorder %s6640_s28, %s6636_s27 }
  0x50   :  { %p6643_p10 = por %p6642_p9, %p6641_p8 }
  0x52   :  { %p6644_p11 = pnand %p6643_p10, %p6637_p7 }
  0x54   :  { %6647 = shalt.err (!%p6644_p11)
}
  0x55   :  { %71 = dma.hbm_to_vmem [thread:$0]  %s6918_s5, 48, %s69_s12, [#allocation11]  }
  0x56   :  { %6670 = dma.done.wait [#allocation5], 384  }
  0x57   :  { %6671 = vsyncadd [#allocation5], 4294966912 }
  0x58   :  { %6672 = dma.done.wait [#allocation8], 37056  }
  0x59   :  { %6673 = vsyncadd [#allocation8], 4294930240 }
  0x5a   :  { %6674 = dma.done.wait [#allocation11], 36912  }
  0x5b   :  { %6675 = vsyncadd [#allocation11], 4294930384  ;;  %v5714_v0 = vld [vmem:[#allocation7 + $0x4] ss:$48 sps:$4 sm:$0xff]   ;;  %v5716_v1 = vld [vmem:[#allocation7] ss:$48 sps:$4 sm:$0xff]  }
  0x5c   :  { %1900 = vmatprep.subr.bf16.mxu1 %v5714_v0  ;;  %v5717_v2 = vld [vmem:[#allocation7 + $0x64] ss:$48 sps:$4 sm:$0xff]   ;;  %v5719_v3 = vld [vmem:[#allocation7 + $0x60] ss:$48 sps:$4 sm:$0xff]   ;;  %v6786_v18 = vld [vmem:[#allocation4 + $0x4] ss:$12 sps:$4 sm:$0xff]  }
  0x5d   :  { %1901 = vmatpush1.bf16.msra.mxu1 %v5716_v1  ;;  %v5720_v4 = vld [vmem:[#allocation7 + $0xc4] ss:$48 sps:$4 sm:$0xff]   ;;  %v5722_v5 = vld [vmem:[#allocation7 + $0xc0] ss:$48 sps:$4 sm:$0xff]   ;;  %1932 = vmatprep.mubr.bf16.mxu1 %v6786_v18  ;;  %v6687_v63 = vmov 0   ;;  %s6688_s5 = smov [#allocation13]  }
  0x5e   :  { %1902 = vmatprep.subr.bf16.mxu1 %v5717_v2  ;;  %v5723_v6 = vld [vmem:[#allocation7 + $0x124] ss:$48 sps:$4 sm:$0xff]   ;;  %v5725_v7 = vld [vmem:[#allocation7 + $0x120] ss:$48 sps:$4 sm:$0xff]   ;;  %2104 = vmatprep.mubr.bf16.mxu0 %v6786_v18  ;;  %s4904_s30 = sshll.u32 %s6688_s5, 4  ;;  %s4905_s30 = int_to_ptr.vmem [resolvable:$true] %s4904_s30 }
  0x5f   :  { %v5726_v8 = vld [vmem:[#allocation7 + $0x184] ss:$48 sps:$4 sm:$0xff]   ;;  %v5728_v9 = vld [vmem:[#allocation7 + $0x180] ss:$48 sps:$4 sm:$0xff]   ;;  %s6648_s7 = scalar_lea.vmem %s4905_s30, 768  ;;  %p6653_p13 = scmp.lt.s32.totalorder %s4905_s30, %s4905_s30 }
  0x60   :  { %v5729_v10 = vld [vmem:[#allocation7 + $0x1e4] ss:$48 sps:$4 sm:$0xff]   ;;  %v5731_v11 = vld [vmem:[#allocation7 + $0x1e0] ss:$48 sps:$4 sm:$0xff]   ;;  %p6649_p12 = scmp.ne.s32.totalorder %s4905_s30, %s6648_s7  ;;  %p6654_p0 = scmp.lt.s32.totalorder %s6648_s7, %s6648_s7 }
  0x61   :  { %1903 = vmatpush1.bf16.msra.mxu1 %v5719_v3  ;;  %v5732_v12 = vld [vmem:[#allocation7 + $0x244] ss:$48 sps:$4 sm:$0xff]   ;;  %v5734_v14 = vld [vmem:[#allocation7 + $0x240] ss:$48 sps:$4 sm:$0xff]  }
  0x62   :  { %1904 = vmatprep.subr.bf16.mxu1 %v5720_v4  ;;  %v5759_v13 = vld [vmem:[#allocation7 + $0x14] ss:$48 sps:$4 sm:$0xff]   ;;  %v5763_v16 = vld [vmem:[#allocation7 + $0x10] ss:$48 sps:$4 sm:$0xff]   ;;  %p6655_p1 = por %p6654_p0, %p6653_p13 }
  0x63   :  { %v5735_v15 = vld [vmem:[#allocation7 + $0x2a4] ss:$48 sps:$4 sm:$0xff]   ;;  %2072 = vmatprep.subr.bf16.mxu0 %v5759_v13  ;;  %v5737_v19 = vld [vmem:[#allocation7 + $0x2a0] ss:$48 sps:$4 sm:$0xff]  }
  0x64   :  { %v5765_v17 = vld [vmem:[#allocation7 + $0x74] ss:$48 sps:$4 sm:$0xff]   ;;  %2073 = vmatpush1.bf16.msra.mxu0 %v5763_v16  ;;  %v5772_v20 = vld [vmem:[#allocation7 + $0x70] ss:$48 sps:$4 sm:$0xff]   ;;  %p6656_p2 = pnand %p6655_p1, %p6649_p12 }
  0x65   :  { %1905 = vmatpush1.bf16.msra.mxu1 %v5722_v5  ;;  %2074 = vmatprep.subr.bf16.mxu0 %v5765_v17  ;;  %v5774_v21 = vld [vmem:[#allocation7 + $0xd4] ss:$48 sps:$4 sm:$0xff]   ;;  %v5779_v23 = vld [vmem:[#allocation7 + $0xd0] ss:$48 sps:$4 sm:$0xff]  }
  0x66   :  { %1906 = vmatprep.subr.bf16.mxu1 %v5723_v6  ;;  %v5738_v22 = vld [vmem:[#allocation7 + $0x304] ss:$48 sps:$4 sm:$0xff]   ;;  %v5740_v25 = vld [vmem:[#allocation7 + $0x300] ss:$48 sps:$4 sm:$0xff]  }
  0x67   :  { %v5780_v24 = vld [vmem:[#allocation7 + $0x134] ss:$48 sps:$4 sm:$0xff]   ;;  %v5785_v27 = vld [vmem:[#allocation7 + $0x130] ss:$48 sps:$4 sm:$0xff]  }
  0x68   :  { %2075 = vmatpush1.bf16.msra.mxu0 %v5772_v20  ;;  %v5741_v26 = vld [vmem:[#allocation7 + $0x364] ss:$48 sps:$4 sm:$0xff]   ;;  %v5743_v29 = vld [vmem:[#allocation7 + $0x360] ss:$48 sps:$4 sm:$0xff]  }
  0x69   :  { %1907 = vmatpush1.bf16.msra.mxu1 %v5725_v7  ;;  %2076 = vmatprep.subr.bf16.mxu0 %v5774_v21  ;;  %v5786_v28 = vld [vmem:[#allocation7 + $0x194] ss:$48 sps:$4 sm:$0xff]   ;;  %v5791_v31 = vld [vmem:[#allocation7 + $0x190] ss:$48 sps:$4 sm:$0xff]  }
  0x6a   :  { %1908 = vmatprep.subr.bf16.mxu1 %v5726_v8  ;;  %v5744_v30 = vld [vmem:[#allocation7 + $0x3c4] ss:$48 sps:$4 sm:$0xff]   ;;  %v5746_v33 = vld [vmem:[#allocation7 + $0x3c0] ss:$48 sps:$4 sm:$0xff]  }
  0x6b   :  { %v5792_v32 = vld [vmem:[#allocation7 + $0x1f4] ss:$48 sps:$4 sm:$0xff]   ;;  %v5797_v35 = vld [vmem:[#allocation7 + $0x1f0] ss:$48 sps:$4 sm:$0xff]  }
  0x6c   :  { %2077 = vmatpush1.bf16.msra.mxu0 %v5779_v23  ;;  %v5747_v34 = vld [vmem:[#allocation7 + $0x424] ss:$48 sps:$4 sm:$0xff]   ;;  %v5749_v37 = vld [vmem:[#allocation7 + $0x420] ss:$48 sps:$4 sm:$0xff]  }
  0x6d   :  { %1909 = vmatpush1.bf16.msra.mxu1 %v5728_v9  ;;  %2078 = vmatprep.subr.bf16.mxu0 %v5780_v24  ;;  %v5798_v36 = vld [vmem:[#allocation7 + $0x254] ss:$48 sps:$4 sm:$0xff]   ;;  %v5803_v39 = vld [vmem:[#allocation7 + $0x250] ss:$48 sps:$4 sm:$0xff]  }
  0x6e   :  { %1910 = vmatprep.subr.bf16.mxu1 %v5729_v10  ;;  %v5750_v38 = vld [vmem:[#allocation7 + $0x484] ss:$48 sps:$4 sm:$0xff]   ;;  %v5752_v41 = vld [vmem:[#allocation7 + $0x480] ss:$48 sps:$4 sm:$0xff]  }
  0x6f   :  { %v5804_v40 = vld [vmem:[#allocation7 + $0x2b4] ss:$48 sps:$4 sm:$0xff]   ;;  %v5809_v43 = vld [vmem:[#allocation7 + $0x2b0] ss:$48 sps:$4 sm:$0xff]  }
  0x70   :  { %2079 = vmatpush1.bf16.msra.mxu0 %v5785_v27  ;;  %v5753_v42 = vld [vmem:[#allocation7 + $0x4e4] ss:$48 sps:$4 sm:$0xff]   ;;  %v5755_v45 = vld [vmem:[#allocation7 + $0x4e0] ss:$48 sps:$4 sm:$0xff]  }
  0x71   :  { %1911 = vmatpush1.bf16.msra.mxu1 %v5731_v11  ;;  %2080 = vmatprep.subr.bf16.mxu0 %v5786_v28  ;;  %v5810_v44 = vld [vmem:[#allocation7 + $0x314] ss:$48 sps:$4 sm:$0xff]   ;;  %v5815_v47 = vld [vmem:[#allocation7 + $0x310] ss:$48 sps:$4 sm:$0xff]  }
  0x72   :  { %1912 = vmatprep.subr.bf16.mxu1 %v5732_v12  ;;  %v5756_v46 = vld [vmem:[#allocation7 + $0x544] ss:$48 sps:$4 sm:$0xff]   ;;  %v5758_v49 = vld [vmem:[#allocation7 + $0x540] ss:$48 sps:$4 sm:$0xff]  }
  0x73   :  { %v5816_v48 = vld [vmem:[#allocation7 + $0x374] ss:$48 sps:$4 sm:$0xff]   ;;  %v5822_v51 = vld [vmem:[#allocation7 + $0x370] ss:$48 sps:$4 sm:$0xff]  }
  0x74   :  { %2081 = vmatpush1.bf16.msra.mxu0 %v5791_v31  ;;  %v5761_v50 = vld [vmem:[#allocation7 + $0x5a4] ss:$48 sps:$4 sm:$0xff]   ;;  %v5764_v53 = vld [vmem:[#allocation7 + $0x5a0] ss:$48 sps:$4 sm:$0xff]  }
  0x75   :  { %1913 = vmatpush1.bf16.msra.mxu1 %v5734_v14  ;;  %2082 = vmatprep.subr.bf16.mxu0 %v5792_v32  ;;  %v5823_v52 = vld [vmem:[#allocation7 + $0x3d4] ss:$48 sps:$4 sm:$0xff]   ;;  %v5828_v55 = vld [vmem:[#allocation7 + $0x3d0] ss:$48 sps:$4 sm:$0xff]  }
  0x76   :  { %1914 = vmatprep.subr.bf16.mxu1 %v5735_v15  ;;  %v5771_v54 = vld [vmem:[#allocation7 + $0x604] ss:$48 sps:$4 sm:$0xff]   ;;  %v5769_v58 = vld [vmem:[#allocation7 + $0x600] ss:$48 sps:$4 sm:$0xff]  }
  0x77   :  { %v5829_v56 = vld [vmem:[#allocation7 + $0x434] ss:$48 sps:$4 sm:$0xff]   ;;  %v5834_v60 = vld [vmem:[#allocation7 + $0x430] ss:$48 sps:$4 sm:$0xff]  }
  0x78   :  { %2083 = vmatpush1.bf16.msra.mxu0 %v5797_v35  ;;  %v6790_v57 = vld [vmem:[#allocation4] ss:$12 sps:$4 sm:$0xff]   ;;  %v5776_v62 = vld [vmem:[#allocation7 + $0x660] ss:$48 sps:$4 sm:$0xff]  }
  0x79   :  { %1915 = vmatpush1.bf16.msra.mxu1 %v5737_v19  ;;  %2084 = vmatprep.subr.bf16.mxu0 %v5798_v36  ;;  %v5778_v59 = vld [vmem:[#allocation7 + $0x664] ss:$48 sps:$4 sm:$0xff]   ;;  %v5840_v1 = vld [vmem:[#allocation7 + $0x490] ss:$48 sps:$4 sm:$0xff]  }
  0x7a   :  { %1916 = vmatprep.subr.bf16.mxu1 %v5738_v22  ;;  %v5835_v61 = vld [vmem:[#allocation7 + $0x494] ss:$48 sps:$4 sm:$0xff]   ;;  %v5782_v3 = vld [vmem:[#allocation7 + $0x6c0] ss:$48 sps:$4 sm:$0xff]  }
  0x7b   :  { %v5784_v0 = vld [vmem:[#allocation7 + $0x6c4] ss:$48 sps:$4 sm:$0xff]   ;;  %v5846_v5 = vld [vmem:[#allocation7 + $0x4f0] ss:$48 sps:$4 sm:$0xff]  }
  0x7c   :  { %2085 = vmatpush1.bf16.msra.mxu0 %v5803_v39  ;;  %v5841_v2 = vld [vmem:[#allocation7 + $0x4f4] ss:$48 sps:$4 sm:$0xff]   ;;  %v5788_v7 = vld [vmem:[#allocation7 + $0x720] ss:$48 sps:$4 sm:$0xff]  }
  0x7d   :  { %1917 = vmatpush1.bf16.msra.mxu1 %v5740_v25  ;;  %2086 = vmatprep.subr.bf16.mxu0 %v5804_v40  ;;  %v5790_v4 = vld [vmem:[#allocation7 + $0x724] ss:$48 sps:$4 sm:$0xff]   ;;  %v5852_v9 = vld [vmem:[#allocation7 + $0x550] ss:$48 sps:$4 sm:$0xff]   ;;  %v5821_v25 = vld [vmem:[#allocation7 + $0xc] ss:$48 sps:$4 sm:$0xff]  }
  0x7e   :  { %1918 = vmatprep.subr.bf16.mxu1 %v5741_v26  ;;  %v5847_v6 = vld [vmem:[#allocation7 + $0x554] ss:$48 sps:$4 sm:$0xff]   ;;  %v5794_v11 = vld [vmem:[#allocation7 + $0x780] ss:$48 sps:$4 sm:$0xff]  }
  0x7f   :  { %v5796_v8 = vld [vmem:[#allocation7 + $0x784] ss:$48 sps:$4 sm:$0xff]   ;;  %v5858_v13 = vld [vmem:[#allocation7 + $0x5b0] ss:$48 sps:$4 sm:$0xff]  }
  0x80   :  { %2087 = vmatpush1.bf16.msra.mxu0 %v5809_v43  ;;  %v5853_v10 = vld [vmem:[#allocation7 + $0x5b4] ss:$48 sps:$4 sm:$0xff]   ;;  %v5800_v15 = vld [vmem:[#allocation7 + $0x7e0] ss:$48 sps:$4 sm:$0xff]  }
  0x81   :  { %1919 = vmatpush1.bf16.msra.mxu1 %v5743_v29  ;;  %2088 = vmatprep.subr.bf16.mxu0 %v5810_v44  ;;  %v5802_v12 = vld [vmem:[#allocation7 + $0x7e4] ss:$48 sps:$4 sm:$0xff]   ;;  %v5859_v17 = vld [vmem:[#allocation7 + $0x610] ss:$48 sps:$4 sm:$0xff]   ;;  %v5819_v29 = vld [vmem:[#allocation7 + $0x8] ss:$48 sps:$4 sm:$0xff]  }
  0x82   :  { %1920 = vmatprep.subr.bf16.mxu1 %v5744_v30  ;;  %v5861_v14 = vld [vmem:[#allocation7 + $0x614] ss:$48 sps:$4 sm:$0xff]   ;;  %v5806_v20 = vld [vmem:[#allocation7 + $0x840] ss:$48 sps:$4 sm:$0xff]   ;;  %v5827_v30 = vld [vmem:[#allocation7 + $0x6c] ss:$48 sps:$4 sm:$0xff]  }
  0x83   :  { %v5808_v16 = vld [vmem:[#allocation7 + $0x844] ss:$48 sps:$4 sm:$0xff]   ;;  %v5865_v22 = vld [vmem:[#allocation7 + $0x670] ss:$48 sps:$4 sm:$0xff]  }
  0x84   :  { %2089 = vmatpush1.bf16.msra.mxu0 %v5815_v47  ;;  %v5867_v19 = vld [vmem:[#allocation7 + $0x674] ss:$48 sps:$4 sm:$0xff]   ;;  %v5812_v24 = vld [vmem:[#allocation7 + $0x8a0] ss:$48 sps:$4 sm:$0xff]  }
  0x85   :  { %1921 = vmatpush1.bf16.msra.mxu1 %v5746_v33  ;;  %2090 = vmatprep.subr.bf16.mxu0 %v5816_v48  ;;  %v5814_v21 = vld [vmem:[#allocation7 + $0x8a4] ss:$48 sps:$4 sm:$0xff]   ;;  %v5871_v26 = vld [vmem:[#allocation7 + $0x6d0] ss:$48 sps:$4 sm:$0xff]   ;;  %v5825_v33 = vld [vmem:[#allocation7 + $0x68] ss:$48 sps:$4 sm:$0xff]  }
  0x86   :  { %1922 = vmatprep.subr.bf16.mxu1 %v5747_v34  ;;  %v5873_v23 = vld [vmem:[#allocation7 + $0x6d4] ss:$48 sps:$4 sm:$0xff]   ;;  %v6796_v28 = vld [vmem:[#allocation4 + $0x8] ss:$12 sps:$4 sm:$0xff]  }
  0x87   :  { %v5879_v27 = vld [vmem:[#allocation7 + $0x734] ss:$48 sps:$4 sm:$0xff]   ;;  %v5877_v31 = vld [vmem:[#allocation7 + $0x730] ss:$48 sps:$4 sm:$0xff]   ;;  %v5833_v34 = vld [vmem:[#allocation7 + $0xcc] ss:$48 sps:$4 sm:$0xff]  }
  0x88   :  { %2091 = vmatpush1.bf16.msra.mxu0 %v5822_v51  ;;  %v5885_v32 = vld [vmem:[#allocation7 + $0x794] ss:$48 sps:$4 sm:$0xff]   ;;  %v5883_v35 = vld [vmem:[#allocation7 + $0x790] ss:$48 sps:$4 sm:$0xff]  }
  0x89   :  { %1923 = vmatpush1.bf16.msra.mxu1 %v5749_v37  ;;  %2092 = vmatprep.subr.bf16.mxu0 %v5823_v52  ;;  %v5891_v36 = vld [vmem:[#allocation7 + $0x7f4] ss:$48 sps:$4 sm:$0xff]   ;;  %v5831_v37 = vld [vmem:[#allocation7 + $0xc8] ss:$48 sps:$4 sm:$0xff]   ;;  %v5889_v39 = vld [vmem:[#allocation7 + $0x7f0] ss:$48 sps:$4 sm:$0xff]  }
  0x8a   :  { %1924 = vmatprep.subr.bf16.mxu1 %v5750_v38  ;;  %v5839_v38 = vld [vmem:[#allocation7 + $0x12c] ss:$48 sps:$4 sm:$0xff]   ;;  %v5897_v40 = vld [vmem:[#allocation7 + $0x854] ss:$48 sps:$4 sm:$0xff]   ;;  %v5895_v43 = vld [vmem:[#allocation7 + $0x850] ss:$48 sps:$4 sm:$0xff]  }
  0x8b   :  { %v5903_v44 = vld [vmem:[#allocation7 + $0x8b4] ss:$48 sps:$4 sm:$0xff]   ;;  %v5901_v47 = vld [vmem:[#allocation7 + $0x8b0] ss:$48 sps:$4 sm:$0xff]  }
  0x8c   :  { %2093 = vmatpush1.bf16.msra.mxu0 %v5828_v55  ;;  %v5909_v48 = vld [vmem:[#allocation7 + $0x24] ss:$48 sps:$4 sm:$0xff]   ;;  %v5907_v51 = vld [vmem:[#allocation7 + $0x20] ss:$48 sps:$4 sm:$0xff]  }
  0x8d   :  { %1925 = vmatpush1.bf16.msra.mxu1 %v5752_v41  ;;  %2094 = vmatprep.subr.bf16.mxu0 %v5829_v56  ;;  %v5837_v41 = vld [vmem:[#allocation7 + $0x128] ss:$48 sps:$4 sm:$0xff]   ;;  %v5915_v52 = vld [vmem:[#allocation7 + $0x84] ss:$48 sps:$4 sm:$0xff]   ;;  %v5913_v55 = vld [vmem:[#allocation7 + $0x80] ss:$48 sps:$4 sm:$0xff]  }
  0x8e   :  { %1926 = vmatprep.subr.bf16.mxu1 %v5753_v42  ;;  %v5845_v42 = vld [vmem:[#allocation7 + $0x18c] ss:$48 sps:$4 sm:$0xff]   ;;  %v5921_v56 = vld [vmem:[#allocation7 + $0xe4] ss:$48 sps:$4 sm:$0xff]  }
  0x90   :  { %2095 = vmatpush1.bf16.msra.mxu0 %v5834_v60  ;;  %v5919_v60 = vld [vmem:[#allocation7 + $0xe0] ss:$48 sps:$4 sm:$0xff]  }
  0x91   :  { %1927 = vmatpush1.bf16.msra.mxu1 %v5755_v45  ;;  %2096 = vmatprep.subr.bf16.mxu0 %v5835_v61  ;;  %v5843_v45 = vld [vmem:[#allocation7 + $0x188] ss:$48 sps:$4 sm:$0xff]   ;;  %v5927_v61 = vld [vmem:[#allocation7 + $0x144] ss:$48 sps:$4 sm:$0xff]  }
  0x92   :  { %1928 = vmatprep.subr.bf16.mxu1 %v5756_v46  ;;  %v5851_v46 = vld [vmem:[#allocation7 + $0x1ec] ss:$48 sps:$4 sm:$0xff]  }
  0x94   :  { %2097 = vmatpush1.bf16.msra.mxu0 %v5840_v1  ;;  %v5925_v1 = vld [vmem:[#allocation7 + $0x140] ss:$48 sps:$4 sm:$0xff]  }
  0x95   :  { %1929 = vmatpush1.bf16.msra.mxu1 %v5758_v49  ;;  %2098 = vmatprep.subr.bf16.mxu0 %v5841_v2  ;;  %v5849_v49 = vld [vmem:[#allocation7 + $0x1e8] ss:$48 sps:$4 sm:$0xff]   ;;  %v5933_v2 = vld [vmem:[#allocation7 + $0x1a4] ss:$48 sps:$4 sm:$0xff]  }
  0x96   :  { %1930 = vmatprep.subr.bf16.mxu1 %v5761_v50  ;;  %v5857_v50 = vld [vmem:[#allocation7 + $0x24c] ss:$48 sps:$4 sm:$0xff]  }
  0x98   :  { %2099 = vmatpush1.bf16.msra.mxu0 %v5846_v5  ;;  %v5939_v5 = vld [vmem:[#allocation7 + $0x204] ss:$48 sps:$4 sm:$0xff]  }
  0x99   :  { %1931 = vmatpush1.bf16.msra.mxu1 %v5764_v53  ;;  %2100 = vmatprep.subr.bf16.mxu0 %v5847_v6  ;;  %v5855_v53 = vld [vmem:[#allocation7 + $0x248] ss:$48 sps:$4 sm:$0xff]  }
  0x9a   :  { %1943 = vmatprep.subr.bf16.mxu1 %v5771_v54  ;;  %v5864_v54 = vld [vmem:[#allocation7 + $0x2ac] ss:$48 sps:$4 sm:$0xff]   ;;  %v5880_v6 = vld [vmem:[#allocation7 + $0x3c8] ss:$48 sps:$4 sm:$0xff]  }
  0x9c   :  { %1933 = vmatmul.mubr.bf16.vlgmr.msra.gmra.mrb[0].mxu1 %v6790_v57  ;;  %2101 = vmatpush1.bf16.msra.mxu0 %v5852_v9  ;;  %v5945_v9 = vld [vmem:[#allocation7 + $0x264] ss:$48 sps:$4 sm:$0xff]  }
  0x9d   :  { %1944 = vmatpush1.bf16.msra.mxu1 %v5769_v58  ;;  %1975 = vmatprep.mubr.bf16.mxu1 %v6687_v63  ;;  %v5862_v58 = vld [vmem:[#allocation7 + $0x2a8] ss:$48 sps:$4 sm:$0xff]  }
  0x9e   :  { %1945 = vmatprep.subr.bf16.mxu1 %v5778_v59  ;;  %2102 = vmatprep.subr.bf16.mxu0 %v5853_v10  ;;  %v5870_v59 = vld [vmem:[#allocation7 + $0x30c] ss:$48 sps:$4 sm:$0xff]   ;;  %v5886_v10 = vld [vmem:[#allocation7 + $0x428] ss:$48 sps:$4 sm:$0xff]  }
  0xa0   :  { %2103 = vmatpush1.bf16.msra.mxu0 %v5858_v13  ;;  %v5951_v13 = vld [vmem:[#allocation7 + $0x2c4] ss:$48 sps:$4 sm:$0xff]  }
  0xa1   :  { %1946 = vmatpush1.bf16.msra.mxu1 %v5776_v62  ;;  %2115 = vmatprep.subr.bf16.mxu0 %v5861_v14  ;;  %v5868_v62 = vld [vmem:[#allocation7 + $0x308] ss:$48 sps:$4 sm:$0xff]  }
  0xa2   :  { %1947 = vmatprep.subr.bf16.mxu1 %v5784_v0  ;;  %v5876_v0 = vld [vmem:[#allocation7 + $0x36c] ss:$48 sps:$4 sm:$0xff]   ;;  %v5892_v14 = vld [vmem:[#allocation7 + $0x488] ss:$48 sps:$4 sm:$0xff]  }
  0xa3   :  { %2105 = vmatmul.mubr.bf16.vlgmr.msra.gmra.mrb[0].mxu0 %v6790_v57 }
  0xa4   :  { %2116 = vmatpush1.bf16.msra.mxu0 %v5859_v17  ;;  %2147 = vmatprep.mubr.bf16.mxu0 %v6687_v63  ;;  %v5957_v17 = vld [vmem:[#allocation7 + $0x324] ss:$48 sps:$4 sm:$0xff]  }
  0xa5   :  { %1948 = vmatpush1.bf16.msra.mxu1 %v5782_v3  ;;  %2117 = vmatprep.subr.bf16.mxu0 %v5867_v19  ;;  %v5874_v3 = vld [vmem:[#allocation7 + $0x368] ss:$48 sps:$4 sm:$0xff]  }
  0xa6   :  { %1949 = vmatprep.subr.bf16.mxu1 %v5790_v4  ;;  %v5931_v4 = vld [vmem:[#allocation7 + $0x1a0] ss:$48 sps:$4 sm:$0xff]   ;;  %v5898_v19 = vld [vmem:[#allocation7 + $0x4e8] ss:$48 sps:$4 sm:$0xff]  }
  0xa8   :  { %2118 = vmatpush1.bf16.msra.mxu0 %v5865_v22  ;;  %v5963_v22 = vld [vmem:[#allocation7 + $0x384] ss:$48 sps:$4 sm:$0xff]  }
  0xa9   :  { %1950 = vmatpush1.bf16.msra.mxu1 %v5788_v7  ;;  %2119 = vmatprep.subr.bf16.mxu0 %v5873_v23  ;;  %v5888_v7 = vld [vmem:[#allocation7 + $0x42c] ss:$48 sps:$4 sm:$0xff]   ;;  %v5904_v23 = vld [vmem:[#allocation7 + $0x548] ss:$48 sps:$4 sm:$0xff]  }
  0xaa   :  { %1951 = vmatprep.subr.bf16.mxu1 %v5796_v8  ;;  %v5937_v8 = vld [vmem:[#allocation7 + $0x200] ss:$48 sps:$4 sm:$0xff]  }
  0xac   :  { %2120 = vmatpush1.bf16.msra.mxu0 %v5871_v26  ;;  %v5969_v26 = vld [vmem:[#allocation7 + $0x3e4] ss:$48 sps:$4 sm:$0xff]  }
  0xad   :  { %1952 = vmatpush1.bf16.msra.mxu1 %v5794_v11  ;;  %2121 = vmatprep.subr.bf16.mxu0 %v5879_v27  ;;  %v5894_v11 = vld [vmem:[#allocation7 + $0x48c] ss:$48 sps:$4 sm:$0xff]   ;;  %v5910_v27 = vld [vmem:[#allocation7 + $0x5a8] ss:$48 sps:$4 sm:$0xff]  }
  0xae   :  { %1953 = vmatprep.subr.bf16.mxu1 %v5802_v12  ;;  %v5943_v12 = vld [vmem:[#allocation7 + $0x260] ss:$48 sps:$4 sm:$0xff]  }
  0xb0   :  { %2122 = vmatpush1.bf16.msra.mxu0 %v5877_v31  ;;  %v5975_v31 = vld [vmem:[#allocation7 + $0x444] ss:$48 sps:$4 sm:$0xff]  }
  0xb1   :  { %1954 = vmatpush1.bf16.msra.mxu1 %v5800_v15  ;;  %2123 = vmatprep.subr.bf16.mxu0 %v5885_v32  ;;  %v5900_v15 = vld [vmem:[#allocation7 + $0x4ec] ss:$48 sps:$4 sm:$0xff]   ;;  %v5916_v32 = vld [vmem:[#allocation7 + $0x608] ss:$48 sps:$4 sm:$0xff]  }
  0xb2   :  { %1955 = vmatprep.subr.bf16.mxu1 %v5808_v16  ;;  %v5949_v16 = vld [vmem:[#allocation7 + $0x2c0] ss:$48 sps:$4 sm:$0xff]  }
  0xb4   :  { %2124 = vmatpush1.bf16.msra.mxu0 %v5883_v35  ;;  %v5981_v35 = vld [vmem:[#allocation7 + $0x4a4] ss:$48 sps:$4 sm:$0xff]  }
  0xb5   :  { %1956 = vmatpush1.bf16.msra.mxu1 %v5806_v20  ;;  %2125 = vmatprep.subr.bf16.mxu0 %v5891_v36  ;;  %v5906_v20 = vld [vmem:[#allocation7 + $0x54c] ss:$48 sps:$4 sm:$0xff]   ;;  %v5922_v36 = vld [vmem:[#allocation7 + $0x668] ss:$48 sps:$4 sm:$0xff]  }
  0xb6   :  { %1957 = vmatprep.subr.bf16.mxu1 %v5814_v21  ;;  %v5955_v21 = vld [vmem:[#allocation7 + $0x320] ss:$48 sps:$4 sm:$0xff]  }
  0xb8   :  { %2126 = vmatpush1.bf16.msra.mxu0 %v5889_v39  ;;  %v5987_v39 = vld [vmem:[#allocation7 + $0x504] ss:$48 sps:$4 sm:$0xff]  }
  0xb9   :  { %1958 = vmatpush1.bf16.msra.mxu1 %v5812_v24  ;;  %2127 = vmatprep.subr.bf16.mxu0 %v5897_v40  ;;  %v5912_v24 = vld [vmem:[#allocation7 + $0x5ac] ss:$48 sps:$4 sm:$0xff]   ;;  %v5928_v40 = vld [vmem:[#allocation7 + $0x6c8] ss:$48 sps:$4 sm:$0xff]  }
  0xba   :  { %1986 = vmatprep.subr.bf16.mxu1 %v5821_v25  ;;  %v5961_v25 = vld [vmem:[#allocation7 + $0x380] ss:$48 sps:$4 sm:$0xff]  }
  0xbc   :  { %1976 = vmatmul.mubr.bf16.vlgmr.msra.gmra.mrb[0].mxu1 %v6796_v28  ;;  %2128 = vmatpush1.bf16.msra.mxu0 %v5895_v43  ;;  %v5993_v43 = vld [vmem:[#allocation7 + $0x564] ss:$48 sps:$4 sm:$0xff]  }
  0xbd   :  { %1987 = vmatpush1.bf16.msra.mxu1 %v5819_v29  ;;  %2018 = vmatprep.mubr.bf16.mxu1 %v6786_v18  ;;  %v5918_v29 = vld [vmem:[#allocation7 + $0x60c] ss:$48 sps:$4 sm:$0xff]  }
  0xbe   :  { %1988 = vmatprep.subr.bf16.mxu1 %v5827_v30  ;;  %2129 = vmatprep.subr.bf16.mxu0 %v5903_v44  ;;  %v5967_v30 = vld [vmem:[#allocation7 + $0x3e0] ss:$48 sps:$4 sm:$0xff]   ;;  %v5934_v44 = vld [vmem:[#allocation7 + $0x728] ss:$48 sps:$4 sm:$0xff]  }
  0xc0   :  { %2130 = vmatpush1.bf16.msra.mxu0 %v5901_v47  ;;  %v5999_v47 = vld [vmem:[#allocation7 + $0x5c4] ss:$48 sps:$4 sm:$0xff]  }
  0xc1   :  { %1989 = vmatpush1.bf16.msra.mxu1 %v5825_v33  ;;  %2244 = vmatprep.subr.bf16.mxu0 %v5909_v48  ;;  %v5924_v33 = vld [vmem:[#allocation7 + $0x66c] ss:$48 sps:$4 sm:$0xff]   ;;  %v5940_v48 = vld [vmem:[#allocation7 + $0x788] ss:$48 sps:$4 sm:$0xff]  }
  0xc2   :  { %1990 = vmatprep.subr.bf16.mxu1 %v5833_v34  ;;  %v5973_v34 = vld [vmem:[#allocation7 + $0x440] ss:$48 sps:$4 sm:$0xff]  }
  0xc3   :  { %2148 = vmatmul.mubr.bf16.vlgmr.msra.gmra.mrb[0].mxu0 %v6796_v28 }
  0xc4   :  { %2245 = vmatpush1.bf16.msra.mxu0 %v5907_v51  ;;  %2276 = vmatprep.mubr.bf16.mxu0 %v6786_v18  ;;  %v5882_v18 = vld [vmem:[#allocation7 + $0x3cc] ss:$48 sps:$4 sm:$0xff]   ;;  %v6005_v51 = vld [vmem:[#allocation7 + $0x624] ss:$48 sps:$4 sm:$0xff]  }
  0xc5   :  { %1991 = vmatpush1.bf16.msra.mxu1 %v5831_v37  ;;  %2246 = vmatprep.subr.bf16.mxu0 %v5915_v52  ;;  %v5930_v37 = vld [vmem:[#allocation7 + $0x6cc] ss:$48 sps:$4 sm:$0xff]   ;;  %v5946_v52 = vld [vmem:[#allocation7 + $0x7e8] ss:$48 sps:$4 sm:$0xff]  }
  0xc6   :  { %1992 = vmatprep.subr.bf16.mxu1 %v5839_v38  ;;  %v5979_v38 = vld [vmem:[#allocation7 + $0x4a0] ss:$48 sps:$4 sm:$0xff]  }
  0xc8   :  { %2247 = vmatpush1.bf16.msra.mxu0 %v5913_v55  ;;  %v6011_v55 = vld [vmem:[#allocation7 + $0x684] ss:$48 sps:$4 sm:$0xff]  }
  0xc9   :  { %1993 = vmatpush1.bf16.msra.mxu1 %v5837_v41  ;;  %2248 = vmatprep.subr.bf16.mxu0 %v5921_v56  ;;  %v5936_v41 = vld [vmem:[#allocation7 + $0x72c] ss:$48 sps:$4 sm:$0xff]   ;;  %v5952_v56 = vld [vmem:[#allocation7 + $0x848] ss:$48 sps:$4 sm:$0xff]  }
  0xca   :  { %1994 = vmatprep.subr.bf16.mxu1 %v5845_v42  ;;  %v5985_v42 = vld [vmem:[#allocation7 + $0x500] ss:$48 sps:$4 sm:$0xff]  }
  0xcc   :  { %2249 = vmatpush1.bf16.msra.mxu0 %v5919_v60  ;;  %v6017_v60 = vld [vmem:[#allocation7 + $0x6e4] ss:$48 sps:$4 sm:$0xff]  }
  0xcd   :  { %1995 = vmatpush1.bf16.msra.mxu1 %v5843_v45  ;;  %2250 = vmatprep.subr.bf16.mxu0 %v5927_v61  ;;  %v5942_v45 = vld [vmem:[#allocation7 + $0x78c] ss:$48 sps:$4 sm:$0xff]   ;;  %v5958_v61 = vld [vmem:[#allocation7 + $0x8a8] ss:$48 sps:$4 sm:$0xff]  }
  0xce   :  { %1996 = vmatprep.subr.bf16.mxu1 %v5851_v46  ;;  %v5991_v46 = vld [vmem:[#allocation7 + $0x560] ss:$48 sps:$4 sm:$0xff]  }
  0xd0   :  { %2251 = vmatpush1.bf16.msra.mxu0 %v5925_v1  ;;  %v6023_v1 = vld [vmem:[#allocation7 + $0x744] ss:$48 sps:$4 sm:$0xff]  }
  0xd1   :  { %1997 = vmatpush1.bf16.msra.mxu1 %v5849_v49  ;;  %2252 = vmatprep.subr.bf16.mxu0 %v5933_v2  ;;  %v5948_v49 = vld [vmem:[#allocation7 + $0x7ec] ss:$48 sps:$4 sm:$0xff]   ;;  %v5964_v2 = vld [vmem:[#allocation7 + $0x18] ss:$48 sps:$4 sm:$0xff]  }
  0xd2   :  { %1998 = vmatprep.subr.bf16.mxu1 %v5857_v50  ;;  %v5997_v50 = vld [vmem:[#allocation7 + $0x5c0] ss:$48 sps:$4 sm:$0xff]  }
  0xd4   :  { %2253 = vmatpush1.bf16.msra.mxu0 %v5931_v4  ;;  %v5970_v4 = vld [vmem:[#allocation7 + $0x78] ss:$48 sps:$4 sm:$0xff]  }
  0xd5   :  { %1999 = vmatpush1.bf16.msra.mxu1 %v5855_v53  ;;  %2254 = vmatprep.subr.bf16.mxu0 %v5939_v5  ;;  %v5954_v53 = vld [vmem:[#allocation7 + $0x84c] ss:$48 sps:$4 sm:$0xff]  }
  0xd6   :  { %2000 = vmatprep.subr.bf16.mxu1 %v5864_v54  ;;  %v6003_v54 = vld [vmem:[#allocation7 + $0x620] ss:$48 sps:$4 sm:$0xff]   ;;  %v5978_v5 = vld [vmem:[#allocation7 + $0xdc] ss:$48 sps:$4 sm:$0xff]  }
  0xd8   :  { %2255 = vmatpush1.bf16.msra.mxu0 %v5937_v8  ;;  %v5976_v8 = vld [vmem:[#allocation7 + $0xd8] ss:$48 sps:$4 sm:$0xff]  }
  0xd9   :  { %2001 = vmatpush1.bf16.msra.mxu1 %v5862_v58  ;;  %2256 = vmatprep.subr.bf16.mxu0 %v5945_v9  ;;  %v5960_v58 = vld [vmem:[#allocation7 + $0x8ac] ss:$48 sps:$4 sm:$0xff]   ;;  %v6035_v9 = vld [vmem:[#allocation7 + $0x804] ss:$48 sps:$4 sm:$0xff]  }
  0xda   :  { %2002 = vmatprep.subr.bf16.mxu1 %v5870_v59  ;;  %v6009_v59 = vld [vmem:[#allocation7 + $0x680] ss:$48 sps:$4 sm:$0xff]  }
  0xdc   :  { %2257 = vmatpush1.bf16.msra.mxu0 %v5943_v12  ;;  %v6041_v12 = vld [vmem:[#allocation7 + $0x864] ss:$48 sps:$4 sm:$0xff]  }
  0xdd   :  { %2003 = vmatpush1.bf16.msra.mxu1 %v5868_v62  ;;  %2258 = vmatprep.subr.bf16.mxu0 %v5951_v13  ;;  %v5966_v62 = vld [vmem:[#allocation7 + $0x1c] ss:$48 sps:$4 sm:$0xff]   ;;  %v5982_v13 = vld [vmem:[#allocation7 + $0x138] ss:$48 sps:$4 sm:$0xff]  }
  0xde   :  { %2004 = vmatprep.subr.bf16.mxu1 %v5876_v0  ;;  %v6015_v0 = vld [vmem:[#allocation7 + $0x6e0] ss:$48 sps:$4 sm:$0xff]  }
  0xe0   :  { %2259 = vmatpush1.bf16.msra.mxu0 %v5949_v16  ;;  %v6047_v16 = vld [vmem:[#allocation7 + $0x8c4] ss:$48 sps:$4 sm:$0xff]  }
  0xe1   :  { %2005 = vmatpush1.bf16.msra.mxu1 %v5874_v3  ;;  %2260 = vmatprep.subr.bf16.mxu0 %v5957_v17  ;;  %v5972_v3 = vld [vmem:[#allocation7 + $0x7c] ss:$48 sps:$4 sm:$0xff]   ;;  %v5988_v17 = vld [vmem:[#allocation7 + $0x198] ss:$48 sps:$4 sm:$0xff]  }
  0xe2   :  { %2006 = vmatprep.subr.bf16.mxu1 %v5882_v18  ;;  %v6029_v18 = vld [vmem:[#allocation7 + $0x7a4] ss:$48 sps:$4 sm:$0xff]  }
  0xe4   :  { %2261 = vmatpush1.bf16.msra.mxu0 %v5955_v21  ;;  %v6056_v21 = vld [vmem:[#allocation10 + $0x4] ss:$12 sps:$4 sm:$0xff]  }
  0xe5   :  { %2007 = vmatpush1.bf16.msra.mxu1 %v5880_v6  ;;  %2262 = vmatprep.subr.bf16.mxu0 %v5963_v22  ;;  %v6807_v6 = vld [vmem:[#allocation4 + $0x4] ss:$12 sps:$4 sm:$0xff]  }
  0xe6   :  { %2008 = vmatprep.subr.bf16.mxu1 %v5888_v7  ;;  %v6027_v7 = vld [vmem:[#allocation7 + $0x7a0] ss:$48 sps:$4 sm:$0xff]   ;;  %v5994_v22 = vld [vmem:[#allocation7 + $0x1f8] ss:$48 sps:$4 sm:$0xff]  }
  0xe8   :  { %2263 = vmatpush1.bf16.msra.mxu0 %v5961_v25  ;;  %v6062_v25 = vld [vmem:[#allocation10 + $0x1c] ss:$12 sps:$4 sm:$0xff]  }
  0xe9   :  { %2009 = vmatpush1.bf16.msra.mxu1 %v5886_v10  ;;  %2264 = vmatprep.subr.bf16.mxu0 %v5969_v26  ;;  %v5984_v10 = vld [vmem:[#allocation7 + $0x13c] ss:$48 sps:$4 sm:$0xff]   ;;  %v6000_v26 = vld [vmem:[#allocation7 + $0x258] ss:$48 sps:$4 sm:$0xff]  }
  0xea   :  { %2010 = vmatprep.subr.bf16.mxu1 %v5894_v11  ;;  %v6033_v11 = vld [vmem:[#allocation7 + $0x800] ss:$48 sps:$4 sm:$0xff]  }
  0xec   :  { %2265 = vmatpush1.bf16.msra.mxu0 %v5967_v30  ;;  %v6068_v30 = vld [vmem:[#allocation10 + $0x34] ss:$12 sps:$4 sm:$0xff]  }
  0xed   :  { %2011 = vmatpush1.bf16.msra.mxu1 %v5892_v14  ;;  %2266 = vmatprep.subr.bf16.mxu0 %v5975_v31  ;;  %v5990_v14 = vld [vmem:[#allocation7 + $0x19c] ss:$48 sps:$4 sm:$0xff]   ;;  %v6006_v31 = vld [vmem:[#allocation7 + $0x2b8] ss:$48 sps:$4 sm:$0xff]  }
  0xee   :  { %2012 = vmatprep.subr.bf16.mxu1 %v5900_v15  ;;  %v6039_v15 = vld [vmem:[#allocation7 + $0x860] ss:$48 sps:$4 sm:$0xff]  }
  0xf0   :  { %2267 = vmatpush1.bf16.msra.mxu0 %v5973_v34  ;;  %v6074_v34 = vld [vmem:[#allocation10 + $0x4c] ss:$12 sps:$4 sm:$0xff]  }
  0xf1   :  { %2013 = vmatpush1.bf16.msra.mxu1 %v5898_v19  ;;  %2268 = vmatprep.subr.bf16.mxu0 %v5981_v35  ;;  %v5996_v19 = vld [vmem:[#allocation7 + $0x1fc] ss:$48 sps:$4 sm:$0xff]   ;;  %v6012_v35 = vld [vmem:[#allocation7 + $0x318] ss:$48 sps:$4 sm:$0xff]  }
  0xf2   :  { %2014 = vmatprep.subr.bf16.mxu1 %v5906_v20  ;;  %v6045_v20 = vld [vmem:[#allocation7 + $0x8c0] ss:$48 sps:$4 sm:$0xff]  }
  0xf4   :  { %2269 = vmatpush1.bf16.msra.mxu0 %v5979_v38  ;;  %v6018_v38 = vld [vmem:[#allocation7 + $0x378] ss:$48 sps:$4 sm:$0xff]  }
  0xf5   :  { %2015 = vmatpush1.bf16.msra.mxu1 %v5904_v23  ;;  %2270 = vmatprep.subr.bf16.mxu0 %v5987_v39  ;;  %v6002_v23 = vld [vmem:[#allocation7 + $0x25c] ss:$48 sps:$4 sm:$0xff]  }
  0xf6   :  { %2016 = vmatprep.subr.bf16.mxu1 %v5912_v24  ;;  %v6054_v24 = vld [vmem:[#allocation10] ss:$12 sps:$4 sm:$0xff]  }
  0xf7   :  { %v6026_v39 = vld [vmem:[#allocation7 + $0x3dc] ss:$48 sps:$4 sm:$0xff]  }
  0xf8   :  { %2271 = vmatpush1.bf16.msra.mxu0 %v5985_v42  ;;  %v6024_v42 = vld [vmem:[#allocation7 + $0x3d8] ss:$48 sps:$4 sm:$0xff]  }
  0xf9   :  { %2017 = vmatpush1.bf16.msra.mxu1 %v5910_v27  ;;  %2272 = vmatprep.subr.bf16.mxu0 %v5993_v43  ;;  %v6008_v27 = vld [vmem:[#allocation7 + $0x2bc] ss:$48 sps:$4 sm:$0xff]  }
  0xfa   :  { %2029 = vmatprep.subr.bf16.mxu1 %v5918_v29  ;;  %v6060_v29 = vld [vmem:[#allocation10 + $0x18] ss:$12 sps:$4 sm:$0xff]   ;;  %v6032_v43 = vld [vmem:[#allocation7 + $0x43c] ss:$48 sps:$4 sm:$0xff]  }
  0xfc   :  { %2019 = vmatmul.mubr.bf16.vlgmr.msra.gmra.mrb[4].mxu1 %v6790_v57  ;;  %2273 = vmatpush1.bf16.msra.mxu0 %v5991_v46  ;;  %v6030_v46 = vld [vmem:[#allocation7 + $0x438] ss:$48 sps:$4 sm:$0xff]  }
  0xfd   :  { %2030 = vmatpush1.bf16.msra.mxu1 %v5916_v32  ;;  %2061 = vmatprep.mubr.bf16.mxu1 %v6687_v63  ;;  %v6014_v32 = vld [vmem:[#allocation7 + $0x31c] ss:$48 sps:$4 sm:$0xff]  }
  0xfe   :  { %2031 = vmatprep.subr.bf16.mxu1 %v5924_v33  ;;  %2274 = vmatprep.subr.bf16.mxu0 %v5999_v47  ;;  %v6066_v33 = vld [vmem:[#allocation10 + $0x30] ss:$12 sps:$4 sm:$0xff]  }
  0xff   :  { %v6038_v47 = vld [vmem:[#allocation7 + $0x49c] ss:$48 sps:$4 sm:$0xff]  }
 0x100   :  { %2275 = vmatpush1.bf16.msra.mxu0 %v5997_v50  ;;  %v6036_v50 = vld [vmem:[#allocation7 + $0x498] ss:$48 sps:$4 sm:$0xff]  }
 0x101   :  { %2032 = vmatpush1.bf16.msra.mxu1 %v5922_v36  ;;  %2287 = vmatprep.subr.bf16.mxu0 %v6005_v51  ;;  %v6020_v36 = vld [vmem:[#allocation7 + $0x37c] ss:$48 sps:$4 sm:$0xff]  }
 0x102   :  { %2033 = vmatprep.subr.bf16.mxu1 %v5930_v37  ;;  %v6072_v37 = vld [vmem:[#allocation10 + $0x48] ss:$12 sps:$4 sm:$0xff]   ;;  %v6044_v51 = vld [vmem:[#allocation7 + $0x4fc] ss:$48 sps:$4 sm:$0xff]  }
 0x103   :  { %2277 = vmatmul.mubr.bf16.vlgmr.msra.gmra.mrb[4].mxu0 %v6790_v57  ;;  %v6021_v57 = vld [vmem:[#allocation7 + $0x740] ss:$48 sps:$4 sm:$0xff]  }
 0x104   :  { %2288 = vmatpush1.bf16.msra.mxu0 %v6003_v54  ;;  %2319 = vmatprep.mubr.bf16.mxu0 %v6687_v63  ;;  %v6042_v54 = vld [vmem:[#allocation7 + $0x4f8] ss:$48 sps:$4 sm:$0xff]  }
 0x105   :  { %2034 = vmatpush1.bf16.msra.mxu1 %v5928_v40  ;;  %2289 = vmatprep.subr.bf16.mxu0 %v6011_v55  ;;  %v6078_v40 = vld [vmem:[#allocation10 + $0x60] ss:$12 sps:$4 sm:$0xff]  }
 0x106   :  { %2035 = vmatprep.subr.bf16.mxu1 %v5936_v41  ;;  %v6086_v41 = vld [vmem:[#allocation10 + $0x7c] ss:$12 sps:$4 sm:$0xff]   ;;  %v6050_v55 = vld [vmem:[#allocation7 + $0x55c] ss:$48 sps:$4 sm:$0xff]  }
 0x108   :  { %2290 = vmatpush1.bf16.msra.mxu0 %v6009_v59  ;;  %v6048_v59 = vld [vmem:[#allocation7 + $0x558] ss:$48 sps:$4 sm:$0xff]  }
 0x109   :  { %2036 = vmatpush1.bf16.msra.mxu1 %v5934_v44  ;;  %2291 = vmatprep.subr.bf16.mxu0 %v6017_v60  ;;  %v6084_v44 = vld [vmem:[#allocation10 + $0x78] ss:$12 sps:$4 sm:$0xff]   ;;  %v6053_v60 = vld [vmem:[#allocation7 + $0x5bc] ss:$48 sps:$4 sm:$0xff]  }
 0x10a   :  { %2037 = vmatprep.subr.bf16.mxu1 %v5942_v45  ;;  %v6092_v45 = vld [vmem:[#allocation10 + $0x94] ss:$12 sps:$4 sm:$0xff]  }
 0x10c   :  { %2292 = vmatpush1.bf16.msra.mxu0 %v6015_v0  ;;  %v6051_v0 = vld [vmem:[#allocation7 + $0x5b8] ss:$48 sps:$4 sm:$0xff]  }
 0x10d   :  { %2038 = vmatpush1.bf16.msra.mxu1 %v5940_v48  ;;  %2293 = vmatprep.subr.bf16.mxu0 %v6023_v1  ;;  %v6090_v48 = vld [vmem:[#allocation10 + $0x90] ss:$12 sps:$4 sm:$0xff]  }
 0x10e   :  { %2039 = vmatprep.subr.bf16.mxu1 %v5948_v49  ;;  %v6098_v49 = vld [vmem:[#allocation10 + $0xac] ss:$12 sps:$4 sm:$0xff]   ;;  %v6059_v1 = vld [vmem:[#allocation7 + $0x61c] ss:$48 sps:$4 sm:$0xff]  }
 0x110   :  { %2294 = vmatpush1.bf16.msra.mxu0 %v6021_v57  ;;  %v6122_v57 = vld [vmem:[#allocation10 + $0x10c] ss:$12 sps:$4 sm:$0xff]  }
 0x111   :  { %2040 = vmatpush1.bf16.msra.mxu1 %v5946_v52  ;;  %2295 = vmatprep.subr.bf16.mxu0 %v6029_v18  ;;  %v6096_v52 = vld [vmem:[#allocation10 + $0xa8] ss:$12 sps:$4 sm:$0xff]   ;;  %v6065_v18 = vld [vmem:[#allocation7 + $0x67c] ss:$48 sps:$4 sm:$0xff]  }
 0x112   :  { %2041 = vmatprep.subr.bf16.mxu1 %v5954_v53  ;;  %v6104_v53 = vld [vmem:[#allocation10 + $0xc4] ss:$12 sps:$4 sm:$0xff]  }
 0x114   :  { %2296 = vmatpush1.bf16.msra.mxu0 %v6027_v7  ;;  %v6811_v7 = vld [vmem:[#allocation4] ss:$12 sps:$4 sm:$0xff]  }
 0x115   :  { %2042 = vmatpush1.bf16.msra.mxu1 %v5952_v56  ;;  %2297 = vmatprep.subr.bf16.mxu0 %v6035_v9  ;;  %v6102_v56 = vld [vmem:[#allocation10 + $0xc0] ss:$12 sps:$4 sm:$0xff]  }
 0x116   :  { %2043 = vmatprep.subr.bf16.mxu1 %v5960_v58  ;;  %v6110_v58 = vld [vmem:[#allocation10 + $0xdc] ss:$12 sps:$4 sm:$0xff]   ;;  %v6071_v9 = vld [vmem:[#allocation7 + $0x6dc] ss:$48 sps:$4 sm:$0xff]  }
 0x118   :  { %2298 = vmatpush1.bf16.msra.mxu0 %v6033_v11  ;;  %v6134_v11 = vld [vmem:[#allocation10 + $0x13c] ss:$12 sps:$4 sm:$0xff]  }
 0x119   :  { %2044 = vmatpush1.bf16.msra.mxu1 %v5958_v61  ;;  %2299 = vmatprep.subr.bf16.mxu0 %v6041_v12  ;;  %v6108_v61 = vld [vmem:[#allocation10 + $0xd8] ss:$12 sps:$4 sm:$0xff]   ;;  %v6069_v12 = vld [vmem:[#allocation7 + $0x6d8] ss:$48 sps:$4 sm:$0xff]  }
 0x11a   :  { %2158 = vmatprep.subr.bf16.mxu1 %v5966_v62  ;;  %v6116_v62 = vld [vmem:[#allocation10 + $0xf4] ss:$12 sps:$4 sm:$0xff]  }
 0x11c   :  { %2062 = vmatmul.mubr.bf16.vlgmr.msra.gmra.mrb[4].mxu1 %v6796_v28  ;;  %2300 = vmatpush1.bf16.msra.mxu0 %v6039_v15  ;;  %v6140_v15 = vld [vmem:[#allocation10 + $0x154] ss:$12 sps:$4 sm:$0xff]  }
 0x11d   :  { %2159 = vmatpush1.bf16.msra.mxu1 %v5964_v2  ;;  %2190 = vmatprep.mubr.bf16.mxu1 %v6807_v6  ;;  %v6114_v2 = vld [vmem:[#allocation10 + $0xf0] ss:$12 sps:$4 sm:$0xff]  }
 0x11e   :  { %2160 = vmatprep.subr.bf16.mxu1 %v5972_v3  ;;  %2301 = vmatprep.subr.bf16.mxu0 %v6047_v16  ;;  %v6057_v3 = vld [vmem:[#allocation7 + $0x618] ss:$48 sps:$4 sm:$0xff]  }
 0x11f   :  { %v6075_v16 = vld [vmem:[#allocation7 + $0x738] ss:$48 sps:$4 sm:$0xff]  }
 0x120   :  { %2302 = vmatpush1.bf16.msra.mxu0 %v6045_v20  ;;  %v6146_v20 = vld [vmem:[#allocation10 + $0x16c] ss:$12 sps:$4 sm:$0xff]  }
 0x121   :  { %2161 = vmatpush1.bf16.msra.mxu1 %v5970_v4  ;;  %4389 = vmatprep.subr.bf16.mxu0 %v6056_v21  ;;  %v6120_v4 = vld [vmem:[#allocation10 + $0x108] ss:$12 sps:$4 sm:$0xff]   ;;  %v6081_v21 = vld [vmem:[#allocation7 + $0x798] ss:$48 sps:$4 sm:$0xff]  }
 0x122   :  { %2162 = vmatprep.subr.bf16.mxu1 %v5978_v5  ;;  %v6128_v5 = vld [vmem:[#allocation10 + $0x124] ss:$12 sps:$4 sm:$0xff]  }
 0x123   :  { %2320 = vmatmul.mubr.bf16.vlgmr.msra.gmra.mrb[4].mxu0 %v6796_v28  ;;  %v6080_v28 = vld [vmem:[#allocation10 + $0x64] ss:$12 sps:$4 sm:$0xff]  }
 0x124   :  { %4390 = vmatpush1.bf16.msra.mxu0 %v6054_v24  ;;  %v6176_v24 = vld [vmem:[#allocation10 + $0x184] ss:$12 sps:$4 sm:$0xff]  }
 0x125   :  { %2163 = vmatpush1.bf16.msra.mxu1 %v5976_v8  ;;  %4391 = vmatprep.subr.bf16.mxu0 %v6062_v25  ;;  %v6063_v8 = vld [vmem:[#allocation7 + $0x678] ss:$48 sps:$4 sm:$0xff]  }
 0x126   :  { %2164 = vmatprep.subr.bf16.mxu1 %v5984_v10  ;;  %v6126_v10 = vld [vmem:[#allocation10 + $0x120] ss:$12 sps:$4 sm:$0xff]  }
 0x127   :  { %v6087_v25 = vld [vmem:[#allocation7 + $0x7f8] ss:$48 sps:$4 sm:$0xff]  }
 0x128   :  { %4392 = vmatpush1.bf16.msra.mxu0 %v6060_v29  ;;  %v6101_v29 = vld [vmem:[#allocation7 + $0x8bc] ss:$48 sps:$4 sm:$0xff]  }
 0x129   :  { %2165 = vmatpush1.bf16.msra.mxu1 %v5982_v13  ;;  %4393 = vmatprep.subr.bf16.mxu0 %v6068_v30  ;;  %v6077_v13 = vld [vmem:[#allocation7 + $0x73c] ss:$48 sps:$4 sm:$0xff]   ;;  %v6099_v30 = vld [vmem:[#allocation7 + $0x8b8] ss:$48 sps:$4 sm:$0xff]  }
 0x12a   :  { %2166 = vmatprep.subr.bf16.mxu1 %v5990_v14  ;;  %v6132_v14 = vld [vmem:[#allocation10 + $0x138] ss:$12 sps:$4 sm:$0xff]  }
 0x12c   :  { %4394 = vmatpush1.bf16.msra.mxu0 %v6066_v33  ;;  %v6113_v33 = vld [vmem:[#allocation7 + $0x8c] ss:$48 sps:$4 sm:$0xff]  }
 0x12d   :  { %2167 = vmatpush1.bf16.msra.mxu1 %v5988_v17  ;;  %4395 = vmatprep.subr.bf16.mxu0 %v6074_v34  ;;  %v6083_v17 = vld [vmem:[#allocation7 + $0x79c] ss:$48 sps:$4 sm:$0xff]  }
 0x12e   :  { %2168 = vmatprep.subr.bf16.mxu1 %v5996_v19  ;;  %v6138_v19 = vld [vmem:[#allocation10 + $0x150] ss:$12 sps:$4 sm:$0xff]  }
 0x12f   :  { %v6815_v34 = vld [vmem:[#allocation4 + $0x8] ss:$12 sps:$4 sm:$0xff]  }
 0x130   :  { %4396 = vmatpush1.bf16.msra.mxu0 %v6072_v37  ;;  %v6117_v37 = vld [vmem:[#allocation7 + $0xe8] ss:$48 sps:$4 sm:$0xff]  }
 0x131   :  { %2169 = vmatpush1.bf16.msra.mxu1 %v5994_v22  ;;  %4397 = vmatprep.subr.bf16.mxu0 %v6080_v28  ;;  %v6089_v22 = vld [vmem:[#allocation7 + $0x7fc] ss:$48 sps:$4 sm:$0xff]   ;;  %v384_v28 = vlaneseq }
 0x132   :  { %2170 = vmatprep.subr.bf16.mxu1 %v6002_v23  ;;  %v6144_v23 = vld [vmem:[#allocation10 + $0x168] ss:$12 sps:$4 sm:$0xff]  }
 0x134   :  { %4398 = vmatpush1.bf16.msra.mxu0 %v6078_v40  ;;  %v6819_v40 = vshrl.u32 %v384_v28, 7  ;;  %v6162_v28 = vld [vmem:[#allocation7 + $0x4a8] ss:$48 sps:$4 sm:$0xff]  }
 0x135   :  { %2171 = vmatpush1.bf16.msra.mxu1 %v6000_v26  ;;  %4399 = vmatprep.subr.bf16.mxu0 %v6086_v41  ;;  %v6095_v26 = vld [vmem:[#allocation7 + $0x85c] ss:$48 sps:$4 sm:$0xff]  }
 0x136   :  { %2172 = vmatprep.subr.bf16.mxu1 %v6008_v27  ;;  %v6093_v27 = vld [vmem:[#allocation7 + $0x858] ss:$48 sps:$4 sm:$0xff]   ;;  %v6131_v41 = vld [vmem:[#allocation7 + $0x1ac] ss:$48 sps:$4 sm:$0xff]  }
 0x138   :  { %4400 = vmatpush1.bf16.msra.mxu0 %v6084_v44  ;;  %v6824_v44 = vsub.s32 0, %v6819_v40 }
 0x139   :  { %2173 = vmatpush1.bf16.msra.mxu1 %v6006_v31  ;;  %4401 = vmatprep.subr.bf16.mxu0 %v6092_v45  ;;  %v6107_v31 = vld [vmem:[#allocation7 + $0x2c] ss:$48 sps:$4 sm:$0xff]  }
 0x13a   :  { %2174 = vmatprep.subr.bf16.mxu1 %v6014_v32  ;;  %v6105_v32 = vld [vmem:[#allocation7 + $0x28] ss:$48 sps:$4 sm:$0xff]   ;;  %v6137_v45 = vld [vmem:[#allocation7 + $0x20c] ss:$48 sps:$4 sm:$0xff]  }
 0x13c   :  { %4402 = vmatpush1.bf16.msra.mxu0 %v6090_v48  ;;  %v6143_v48 = vld [vmem:[#allocation7 + $0x26c] ss:$48 sps:$4 sm:$0xff]  }
 0x13d   :  { %2175 = vmatpush1.bf16.msra.mxu1 %v6012_v35  ;;  %4403 = vmatprep.subr.bf16.mxu0 %v6098_v49  ;;  %v6111_v35 = vld [vmem:[#allocation7 + $0x88] ss:$48 sps:$4 sm:$0xff]  }
 0x13e   :  { %2176 = vmatprep.subr.bf16.mxu1 %v6020_v36  ;;  %v6119_v36 = vld [vmem:[#allocation7 + $0xec] ss:$48 sps:$4 sm:$0xff]  }
 0x140   :  { %4404 = vmatpush1.bf16.msra.mxu0 %v6096_v52 }
 0x141   :  { %2177 = vmatpush1.bf16.msra.mxu1 %v6018_v38  ;;  %4405 = vmatprep.subr.bf16.mxu0 %v6104_v53  ;;  %v6125_v38 = vld [vmem:[#allocation7 + $0x14c] ss:$48 sps:$4 sm:$0xff]   ;;  %v6141_v53 = vld [vmem:[#allocation7 + $0x268] ss:$48 sps:$4 sm:$0xff]  }
 0x142   :  { %2178 = vmatprep.subr.bf16.mxu1 %v6026_v39  ;;  %v6123_v39 = vld [vmem:[#allocation7 + $0x148] ss:$48 sps:$4 sm:$0xff]  }
 0x144   :  { %4406 = vmatpush1.bf16.msra.mxu0 %v6102_v56 }
 0x145   :  { %2179 = vmatpush1.bf16.msra.mxu1 %v6024_v42  ;;  %4407 = vmatprep.subr.bf16.mxu0 %v6110_v58  ;;  %v6129_v42 = vld [vmem:[#allocation7 + $0x1a8] ss:$48 sps:$4 sm:$0xff]  }
 0x146   :  { %2180 = vmatprep.subr.bf16.mxu1 %v6032_v43  ;;  %v6821_v43 = vld [vmem:[#allocation9] sm:$0xff] }
 0x148   :  { %4408 = vmatpush1.bf16.msra.mxu0 %v6108_v61  ;;  %v6147_v61 = vld [vmem:[#allocation7 + $0x2c8] ss:$48 sps:$4 sm:$0xff]  }
 0x149   :  { %2181 = vmatpush1.bf16.msra.mxu1 %v6030_v46  ;;  %4409 = vmatprep.subr.bf16.mxu0 %v6116_v62  ;;  %v6135_v46 = vld [vmem:[#allocation7 + $0x208] ss:$48 sps:$4 sm:$0xff]  }
 0x14a   :  { %2182 = vmatprep.subr.bf16.mxu1 %v6038_v47  ;;  %v387_v47 = vrot.slane %v6821_v43, %v6824_v44 }
 0x14c   :  { %4410 = vmatpush1.bf16.msra.mxu0 %v6114_v2  ;;  %v6152_v2 = vld [vmem:[#allocation7 + $0x32c] ss:$48 sps:$4 sm:$0xff]  }
 0x14d   :  { %2183 = vmatpush1.bf16.msra.mxu1 %v6036_v50  ;;  %4411 = vmatprep.subr.bf16.mxu0 %v6122_v57 }
 0x14e   :  { %2184 = vmatprep.subr.bf16.mxu1 %v6044_v51 }
 0x150   :  { %4412 = vmatpush1.bf16.msra.mxu0 %v6120_v4  ;;  %v6150_v4 = vld [vmem:[#allocation7 + $0x328] ss:$48 sps:$4 sm:$0xff]  }
 0x151   :  { %2185 = vmatpush1.bf16.msra.mxu1 %v6042_v54  ;;  %4413 = vmatprep.subr.bf16.mxu0 %v6128_v5  ;;  %v6149_v54 = vld [vmem:[#allocation7 + $0x2cc] ss:$48 sps:$4 sm:$0xff]  }
 0x152   :  { %2186 = vmatprep.subr.bf16.mxu1 %v6050_v55  ;;  %v6174_v5 = vld [vmem:[#allocation10 + $0x180] ss:$12 sps:$4 sm:$0xff]  }
 0x154   :  { %4414 = vmatpush1.bf16.msra.mxu0 %v6126_v10  ;;  %v6153_v10 = vld [vmem:[#allocation7 + $0x388] ss:$48 sps:$4 sm:$0xff]  }
 0x155   :  { %2187 = vmatpush1.bf16.msra.mxu1 %v6048_v59  ;;  %4415 = vmatprep.subr.bf16.mxu0 %v6134_v11  ;;  %v6180_v11 = vld [vmem:[#allocation10 + $0x198] ss:$12 sps:$4 sm:$0xff]  }
 0x156   :  { %2188 = vmatprep.subr.bf16.mxu1 %v6053_v60 }
 0x158   :  { %4416 = vmatpush1.bf16.msra.mxu0 %v6132_v14  ;;  %v402_v14 = vsub.s32 4, %v6819_v40 }
 0x159   :  { %2189 = vmatpush1.bf16.msra.mxu1 %v6051_v0  ;;  %4417 = vmatprep.subr.bf16.mxu0 %v6140_v15  ;;  %v406_v15 = vsub.s32 5, %v6819_v40 }
 0x15a   :  { %2201 = vmatprep.subr.bf16.mxu1 %v6059_v1 }
 0x15c   :  { %2191 = vmatmul.mubr.bf16.vlgmr.msra.gmra.mrb[8].mxu1 %v6811_v7  ;;  %4418 = vmatpush1.bf16.msra.mxu0 %v6138_v19  ;;  %v6161_v19 = vld [vmem:[#allocation7 + $0x44c] ss:$48 sps:$4 sm:$0xff]  }
 0x15d   :  { %2202 = vmatpush1.bf16.msra.mxu1 %v6057_v3  ;;  %2233 = vmatprep.mubr.bf16.mxu1 %v6687_v63 }
 0x15e   :  { %2203 = vmatprep.subr.bf16.mxu1 %v6065_v18  ;;  %4419 = vmatprep.subr.bf16.mxu0 %v6146_v20  ;;  %v6194_v20 = vld [vmem:[#allocation10 + $0x1cc] ss:$12 sps:$4 sm:$0xff]  }
 0x160   :  { %4420 = vmatpush1.bf16.msra.mxu0 %v6144_v23  ;;  %v6159_v23 = vld [vmem:[#allocation7 + $0x448] ss:$48 sps:$4 sm:$0xff]  }
 0x161   :  { %2204 = vmatpush1.bf16.msra.mxu1 %v6063_v8  ;;  %4432 = vmatprep.subr.bf16.mxu0 %v6176_v24  ;;  %v6155_v8 = vld [vmem:[#allocation7 + $0x38c] ss:$48 sps:$4 sm:$0xff]   ;;  %v6192_v24 = vld [vmem:[#allocation10 + $0x1c8] ss:$12 sps:$4 sm:$0xff]  }
 0x162   :  { %2205 = vmatprep.subr.bf16.mxu1 %v6071_v9  ;;  %v6182_v9 = vld [vmem:[#allocation10 + $0x19c] ss:$12 sps:$4 sm:$0xff]  }
 0x165   :  { %2206 = vmatpush1.bf16.msra.mxu1 %v6069_v12  ;;  %v6158_v12 = vld [vmem:[#allocation7 + $0x3ec] ss:$48 sps:$4 sm:$0xff]  }
 0x166   :  { %2207 = vmatprep.subr.bf16.mxu1 %v6077_v13  ;;  %v6188_v13 = vld [vmem:[#allocation10 + $0x1b4] ss:$12 sps:$4 sm:$0xff]  }
 0x169   :  { %2208 = vmatpush1.bf16.msra.mxu1 %v6075_v16  ;;  %v6156_v16 = vld [vmem:[#allocation7 + $0x3e8] ss:$48 sps:$4 sm:$0xff]  }
 0x16a   :  { %2209 = vmatprep.subr.bf16.mxu1 %v6083_v17  ;;  %v6186_v17 = vld [vmem:[#allocation10 + $0x1b0] ss:$12 sps:$4 sm:$0xff]  }
 0x16d   :  { %2210 = vmatpush1.bf16.msra.mxu1 %v6081_v21  ;;  %v403_v21 = vrot.slane %v6821_v43, %v402_v14  ;;  %v6236_v14 = vld [vmem:[#allocation10 + $0x288] ss:$12 sps:$4 sm:$0xff]  }
 0x16e   :  { %2211 = vmatprep.subr.bf16.mxu1 %v6089_v22  ;;  %v407_v22 = vrot.slane %v6821_v43, %v406_v15  ;;  %v6243_v15 = vld [vmem:[#allocation10 + $0x2a4] ss:$12 sps:$4 sm:$0xff]  }
 0x171   :  { %2212 = vmatpush1.bf16.msra.mxu1 %v6087_v25  ;;  %v6164_v25 = vld [vmem:[#allocation7 + $0x4ac] ss:$48 sps:$4 sm:$0xff]  }
 0x172   :  { %2213 = vmatprep.subr.bf16.mxu1 %v6095_v26  ;;  %v6200_v26 = vld [vmem:[#allocation10 + $0x1e4] ss:$12 sps:$4 sm:$0xff]  }
 0x175   :  { %2214 = vmatpush1.bf16.msra.mxu1 %v6093_v27 }
 0x176   :  { %2215 = vmatprep.subr.bf16.mxu1 %v6101_v29 }
 0x179   :  { %2216 = vmatpush1.bf16.msra.mxu1 %v6099_v30 }
 0x17a   :  { %2330 = vmatprep.subr.bf16.mxu1 %v6107_v31 }
 0x17c   :  { %2234 = vmatmul.mubr.bf16.vlgmr.msra.gmra.mrb[8].mxu1 %v6815_v34 }
 0x17d   :  { %2331 = vmatpush1.bf16.msra.mxu1 %v6105_v32  ;;  %2362 = vmatprep.mubr.bf16.mxu1 %v6807_v6  ;;  %v6827_v6 = vsub.s32 1, %v6819_v40 }
 0x17e   :  { %2332 = vmatprep.subr.bf16.mxu1 %v6113_v33  ;;  %v6198_v33 = vld [vmem:[#allocation10 + $0x1e0] ss:$12 sps:$4 sm:$0xff]  }
 0x17f   :  { %v391_v49 = vrot.slane %v6821_v43, %v6827_v6 }
 0x181   :  { %2333 = vmatpush1.bf16.msra.mxu1 %v6111_v35 }
 0x182   :  { %2334 = vmatprep.subr.bf16.mxu1 %v6119_v36 }
 0x185   :  { %2335 = vmatpush1.bf16.msra.mxu1 %v6117_v37 }
 0x186   :  { %2336 = vmatprep.subr.bf16.mxu1 %v6125_v38 }
 0x189   :  { %2337 = vmatpush1.bf16.msra.mxu1 %v6123_v39 }
 0x18a   :  { %2338 = vmatprep.subr.bf16.mxu1 %v6131_v41  ;;  %v6206_v41 = vld [vmem:[#allocation10 + $0x1fc] ss:$12 sps:$4 sm:$0xff]  }
 0x18d   :  { %2339 = vmatpush1.bf16.msra.mxu1 %v6129_v42  ;;  %v6167_v42 = vld [vmem:[#allocation7 + $0x50c] ss:$48 sps:$4 sm:$0xff]  }
 0x18e   :  { %2340 = vmatprep.subr.bf16.mxu1 %v6137_v45 }
 0x18f   :  { %v1977_v50 = vpop.f32.mrb[0].mxu1 }
 0x190   :  { %v5629_v51 = vadd.f32 %v1977_v50, %v387_v47  ;;  %v1979_v52 = vpop.f32.mrb[1].mxu1  ;;  %v6170_v50 = vld [vmem:[#allocation7 + $0x56c] ss:$48 sps:$4 sm:$0xff]  }
 0x191   :  { %v5630_v55 = vadd.f32 %v1979_v52, %v391_v49  ;;  %v1981_v56 = vpop.f32.mrb[2].mxu1  ;;  %2341 = vmatpush1.bf16.msra.mxu1 %v6135_v46  ;;  %v6212_v52 = vld [vmem:[#allocation10 + $0x214] ss:$12 sps:$4 sm:$0xff]  }
 0x192   :  { %v5631_v58 = vadd.f32 %v1981_v56, %v387_v47  ;;  %v1983_v59 = vpop.f32.mrb[3].mxu1  ;;  %2342 = vmatprep.subr.bf16.mxu1 %v6143_v48  ;;  %v2416_v62 = vmax.f32 %v5629_v51, 0.0  ;;  %v6165_v47 = vld [vmem:[#allocation7 + $0x508] ss:$48 sps:$4 sm:$0xff]  }
 0x193   :  { %v5632_v60 = vadd.f32 %v1983_v59, %v391_v49  ;;  %v2417_v0 = vmax.f32 %v5630_v55, 0.0  ;;  %v6204_v49 = vld [vmem:[#allocation10 + $0x1f8] ss:$12 sps:$4 sm:$0xff]   ;;  %v6173_v55 = vld [vmem:[#allocation7 + $0x5cc] ss:$48 sps:$4 sm:$0xff]  }
 0x194   :  { %v2428_v1 = vmax.f32 %v5631_v58, 0.0  ;;  %v6218_v56 = vld [vmem:[#allocation10 + $0x22c] ss:$12 sps:$4 sm:$0xff]   ;;  %v6216_v59 = vld [vmem:[#allocation10 + $0x228] ss:$12 sps:$4 sm:$0xff]  }
 0x195   :  { %v2429_v3 = vmax.f32 %v5632_v60, 0.0  ;;  %2343 = vmatpush1.bf16.msra.mxu1 %v6141_v53  ;;  %v6168_v53 = vld [vmem:[#allocation7 + $0x568] ss:$48 sps:$4 sm:$0xff]   ;;  %v6179_v60 = vld [vmem:[#allocation7 + $0x62c] ss:$48 sps:$4 sm:$0xff]  }
 0x196   :  { %v6833_v57 = vpack.c.bf16 %v2428_v1, %v2416_v62  ;;  %2344 = vmatprep.subr.bf16.mxu1 %v6149_v54  ;;  %v2149_v27 = vpop.f32.mrb[0].mxu0  ;;  %v6210_v54 = vld [vmem:[#allocation10 + $0x210] ss:$12 sps:$4 sm:$0xff]   ;;  %v6222_v62 = vld [vmem:[#allocation10 + $0x240] ss:$12 sps:$4 sm:$0xff]  }
 0x197   :  { %v6835_v18 = vpack.c.bf16 %v2429_v3, %v2417_v0  ;;  %v5637_v29 = vadd.f32 %v2149_v27, %v403_v21  ;;  %v2151_v30 = vpop.f32.mrb[1].mxu0  ;;  %v6171_v58 = vld [vmem:[#allocation7 + $0x5c8] ss:$48 sps:$4 sm:$0xff]   ;;  %v6226_v3 = vld [vmem:[#allocation10 + $0x258] ss:$12 sps:$4 sm:$0xff]  }
 0x198   :  { %v5638_v31 = vadd.f32 %v2151_v30, %v407_v22  ;;  %v2153_v32 = vpop.f32.mrb[2].mxu0  ;;  %v6177_v0 = vld [vmem:[#allocation7 + $0x628] ss:$48 sps:$4 sm:$0xff]   ;;  %v6221_v27 = vld [vmem:[#allocation7 + $0x8cc] ss:$48 sps:$4 sm:$0xff]  }
 0x199   :  { %2345 = vmatpush1.bf16.msra.mxu1 %v6147_v61  ;;  %4421 = vmatprep.mubr.bf16.mxu0 %v6835_v18  ;;  %v2420_v35 = vmax.f32 %v5637_v29, 0.0  ;;  %v5639_v36 = vadd.f32 %v2153_v32, %v403_v21  ;;  %v2155_v37 = vpop.f32.mrb[3].mxu0  ;;  %v6224_v61 = vld [vmem:[#allocation10 + $0x244] ss:$12 sps:$4 sm:$0xff]   ;;  %v6228_v1 = vld [vmem:[#allocation10 + $0x25c] ss:$12 sps:$4 sm:$0xff]  }
 0x19a   :  { %4422 = vmatmul.mubr.bf16.vlgmr.msra.gmra.mrb[8].mxu0 %v6833_v57  ;;  %2346 = vmatprep.subr.bf16.mxu1 %v6152_v2  ;;  %v2421_v38 = vmax.f32 %v5638_v31, 0.0  ;;  %v5640_v39 = vadd.f32 %v2155_v37, %v407_v22  ;;  %v6185_v2 = vld [vmem:[#allocation7 + $0x68c] ss:$48 sps:$4 sm:$0xff]   ;;  %v6246_v21 = vld [vmem:[#allocation10 + $0x2b8] ss:$12 sps:$4 sm:$0xff]  }
 0x19b   :  { %4433 = vmatpush1.bf16.msra.mxu0 %v6174_v5  ;;  %v2432_v45 = vmax.f32 %v5639_v36, 0.0  ;;  %v6191_v5 = vld [vmem:[#allocation7 + $0x6ec] ss:$48 sps:$4 sm:$0xff]   ;;  %v6256_v29 = vld [vmem:[#allocation10 + $0x2e8] ss:$12 sps:$4 sm:$0xff]  }
 0x19c   :  { %4434 = vmatprep.subr.bf16.mxu0 %v6182_v9  ;;  %v2433_v46 = vmax.f32 %v5640_v39, 0.0  ;;  %v6189_v9 = vld [vmem:[#allocation7 + $0x6e8] ss:$48 sps:$4 sm:$0xff]   ;;  %v6215_v22 = vld [vmem:[#allocation7 + $0x86c] ss:$48 sps:$4 sm:$0xff]  }
 0x19d   :  { %2347 = vmatpush1.bf16.msra.mxu1 %v6150_v4  ;;  %v6843_v48 = vpack.c.bf16 %v2432_v45, %v2420_v35  ;;  %v6183_v4 = vld [vmem:[#allocation7 + $0x688] ss:$48 sps:$4 sm:$0xff]   ;;  %v6263_v31 = vld [vmem:[#allocation10 + $0x304] ss:$12 sps:$4 sm:$0xff]   ;;  %v6225_v32 = vld [vmem:[#allocation10 + $0xc8] ss:$12 sps:$4 sm:$0xff]  }
 0x19e   :  { %2348 = vmatprep.subr.bf16.mxu1 %v6155_v8  ;;  %v6845_v51 = vpack.c.bf16 %v2433_v46, %v2421_v38  ;;  %v6233_v8 = vld [vmem:[#allocation10 + $0x274] ss:$12 sps:$4 sm:$0xff]   ;;  %v6219_v30 = vld [vmem:[#allocation7 + $0x8c8] ss:$48 sps:$4 sm:$0xff]   ;;  %v6235_v37 = vld [vmem:[#allocation10 + $0xf8] ss:$12 sps:$4 sm:$0xff]  }
 0x19f   :  { %4435 = vmatpush1.bf16.msra.mxu0 %v6180_v11  ;;  %v6197_v11 = vld [vmem:[#allocation7 + $0x74c] ss:$48 sps:$4 sm:$0xff]   ;;  %v6249_v45 = vld [vmem:[#allocation10 + $0x68] ss:$12 sps:$4 sm:$0xff]  }
 0x1a0   :  { %4436 = vmatprep.subr.bf16.mxu0 %v6188_v13  ;;  %v6195_v13 = vld [vmem:[#allocation7 + $0x748] ss:$48 sps:$4 sm:$0xff]  }
 0x1a1   :  { %2349 = vmatpush1.bf16.msra.mxu1 %v6153_v10  ;;  %v6231_v10 = vld [vmem:[#allocation10 + $0x270] ss:$12 sps:$4 sm:$0xff]   ;;  %v6230_v35 = vld [vmem:[#allocation10 + $0xe0] ss:$12 sps:$4 sm:$0xff]  }
 0x1a2   :  { %2350 = vmatprep.subr.bf16.mxu1 %v6158_v12  ;;  %v6238_v12 = vld [vmem:[#allocation10 + $0x28c] ss:$12 sps:$4 sm:$0xff]   ;;  %v6240_v38 = vld [vmem:[#allocation10 + $0x110] ss:$12 sps:$4 sm:$0xff]  }
 0x1a3   :  { %4437 = vmatpush1.bf16.msra.mxu0 %v6186_v17  ;;  %v6209_v17 = vld [vmem:[#allocation7 + $0x80c] ss:$48 sps:$4 sm:$0xff]  }
 0x1a4   :  { %4438 = vmatprep.subr.bf16.mxu0 %v6194_v20  ;;  %v6207_v20 = vld [vmem:[#allocation7 + $0x808] ss:$48 sps:$4 sm:$0xff]  }
 0x1a5   :  { %2351 = vmatpush1.bf16.msra.mxu1 %v6156_v16  ;;  %v6201_v16 = vld [vmem:[#allocation7 + $0x7a8] ss:$48 sps:$4 sm:$0xff]  }
 0x1a6   :  { %2352 = vmatprep.subr.bf16.mxu1 %v6161_v19  ;;  %v6248_v19 = vld [vmem:[#allocation10 + $0x2bc] ss:$12 sps:$4 sm:$0xff]   ;;  %v6234_v36 = vld [vmem:[#allocation10 + $0x20] ss:$12 sps:$4 sm:$0xff]  }
 0x1a7   :  { %4439 = vmatpush1.bf16.msra.mxu0 %v6192_v24  ;;  %v6251_v24 = vld [vmem:[#allocation10 + $0x2d0] ss:$12 sps:$4 sm:$0xff]  }
 0x1a8   :  { %4440 = vmatprep.subr.bf16.mxu0 %v6200_v26  ;;  %v6258_v26 = vld [vmem:[#allocation10 + $0x2ec] ss:$12 sps:$4 sm:$0xff]   ;;  %v6244_v39 = vld [vmem:[#allocation10 + $0x50] ss:$12 sps:$4 sm:$0xff]  }
 0x1a9   :  { %2353 = vmatpush1.bf16.msra.mxu1 %v6159_v23  ;;  %v6253_v23 = vld [vmem:[#allocation10 + $0x2d4] ss:$12 sps:$4 sm:$0xff]  }
 0x1aa   :  { %2354 = vmatprep.subr.bf16.mxu1 %v6164_v25  ;;  %v6213_v25 = vld [vmem:[#allocation7 + $0x868] ss:$48 sps:$4 sm:$0xff]  }
 0x1ab   :  { %4441 = vmatpush1.bf16.msra.mxu0 %v6198_v33  ;;  %v6229_v33 = vld [vmem:[#allocation10 + $0x8] ss:$12 sps:$4 sm:$0xff]  }
 0x1ac   :  { %4442 = vmatprep.subr.bf16.mxu0 %v6206_v41  ;;  %v6245_v41 = vld [vmem:[#allocation10 + $0x128] ss:$12 sps:$4 sm:$0xff]  }
 0x1ad   :  { %2355 = vmatpush1.bf16.msra.mxu1 %v6162_v28  ;;  %v6239_v28 = vld [vmem:[#allocation10 + $0x38] ss:$12 sps:$4 sm:$0xff]  }
 0x1ae   :  { %2356 = vmatprep.subr.bf16.mxu1 %v6167_v42  ;;  %v6852_v42 = vsub.s32 2, %v6819_v40 }
 0x1af   :  { %4443 = vmatpush1.bf16.msra.mxu0 %v6204_v49  ;;  %v6254_v49 = vld [vmem:[#allocation10 + $0x80] ss:$12 sps:$4 sm:$0xff]  }
 0x1b0   :  { %4444 = vmatprep.subr.bf16.mxu0 %v6212_v52  ;;  %v395_v46 = vrot.slane %v6821_v43, %v6852_v42 }
 0x1b1   :  { %2357 = vmatpush1.bf16.msra.mxu1 %v6165_v47 }
 0x1b2   :  { %2358 = vmatprep.subr.bf16.mxu1 %v6170_v50  ;;  %v6255_v50 = vld [vmem:[#allocation10 + $0x158] ss:$12 sps:$4 sm:$0xff]  }
 0x1b3   :  { %4445 = vmatpush1.bf16.msra.mxu0 %v6210_v54 }
 0x1b4   :  { %4446 = vmatprep.subr.bf16.mxu0 %v6218_v56 }
 0x1b5   :  { %2359 = vmatpush1.bf16.msra.mxu1 %v6168_v53 }
 0x1b6   :  { %2360 = vmatprep.subr.bf16.mxu1 %v6173_v55 }
 0x1b7   :  { %4447 = vmatpush1.bf16.msra.mxu0 %v6216_v59 }
 0x1b8   :  { %4448 = vmatprep.subr.bf16.mxu0 %v6224_v61  ;;  %v6260_v61 = vld [vmem:[#allocation10 + $0x170] ss:$12 sps:$4 sm:$0xff]  }
 0x1b9   :  { %2361 = vmatpush1.bf16.msra.mxu1 %v6171_v58  ;;  %v6259_v58 = vld [vmem:[#allocation10 + $0x98] ss:$12 sps:$4 sm:$0xff]  }
 0x1ba   :  { %2373 = vmatprep.subr.bf16.mxu1 %v6179_v60 }
 0x1bb   :  { %4449 = vmatpush1.bf16.msra.mxu0 %v6222_v62 }
 0x1bc   :  { %2363 = vmatmul.mubr.bf16.vlgmr.msra.gmra.mrb[12].mxu1 %v6811_v7  ;;  %4450 = vmatprep.subr.bf16.mxu0 %v6228_v1  ;;  %v6203_v7 = vld [vmem:[#allocation7 + $0x7ac] ss:$48 sps:$4 sm:$0xff]  }
 0x1bd   :  { %2374 = vmatpush1.bf16.msra.mxu1 %v6177_v0  ;;  %2405 = vmatprep.mubr.bf16.mxu1 %v6687_v63  ;;  %v6241_v63 = vld [vmem:[#allocation10 + $0x2a0] ss:$12 sps:$4 sm:$0xff]  }
 0x1be   :  { %2375 = vmatprep.subr.bf16.mxu1 %v6185_v2 }
 0x1bf   :  { %4451 = vmatpush1.bf16.msra.mxu0 %v6226_v3 }
 0x1c0   :  { %4452 = vmatprep.subr.bf16.mxu0 %v6233_v8 }
 0x1c1   :  { %2376 = vmatpush1.bf16.msra.mxu1 %v6183_v4 }
 0x1c2   :  { %2377 = vmatprep.subr.bf16.mxu1 %v6191_v5  ;;  %v6265_v5 = vld [vmem:[#allocation10 + $0x248] ss:$12 sps:$4 sm:$0xff]  }
 0x1c3   :  { %4453 = vmatpush1.bf16.msra.mxu0 %v6231_v10  ;;  %v6268_v10 = vld [vmem:[#allocation10 + $0x31c] ss:$12 sps:$4 sm:$0xff]  }
 0x1c4   :  { %4454 = vmatprep.subr.bf16.mxu0 %v6238_v12  ;;  %v6270_v12 = vld [vmem:[#allocation10 + $0x260] ss:$12 sps:$4 sm:$0xff]  }
 0x1c5   :  { %2378 = vmatpush1.bf16.msra.mxu1 %v6189_v9  ;;  %v6261_v9 = vld [vmem:[#allocation10 + $0x300] ss:$12 sps:$4 sm:$0xff]  }
 0x1c6   :  { %2379 = vmatprep.subr.bf16.mxu1 %v6197_v11  ;;  %v6269_v11 = vld [vmem:[#allocation10 + $0x188] ss:$12 sps:$4 sm:$0xff]  }
 0x1c7   :  { %4455 = vmatpush1.bf16.msra.mxu0 %v6236_v14  ;;  %v6273_v14 = vld [vmem:[#allocation10 + $0x334] ss:$12 sps:$4 sm:$0xff]  }
 0x1c8   :  { %4456 = vmatprep.subr.bf16.mxu0 %v6243_v15  ;;  %v6275_v15 = vld [vmem:[#allocation10 + $0x278] ss:$12 sps:$4 sm:$0xff]  }
 0x1c9   :  { %2380 = vmatpush1.bf16.msra.mxu1 %v6195_v13  ;;  %v6266_v13 = vld [vmem:[#allocation10 + $0x318] ss:$12 sps:$4 sm:$0xff]  }
 0x1ca   :  { %2381 = vmatprep.subr.bf16.mxu1 %v6203_v7  ;;  %v6274_v7 = vld [vmem:[#allocation10 + $0x1a0] ss:$12 sps:$4 sm:$0xff]  }
 0x1cb   :  { %4457 = vmatpush1.bf16.msra.mxu0 %v6241_v63  ;;  %v6271_v63 = vld [vmem:[#allocation10 + $0x330] ss:$12 sps:$4 sm:$0xff]  }
 0x1cc   :  { %4458 = vmatprep.subr.bf16.mxu0 %v6248_v19  ;;  %v6279_v19 = vld [vmem:[#allocation10 + $0x1b8] ss:$12 sps:$4 sm:$0xff]  }
 0x1cd   :  { %2382 = vmatpush1.bf16.msra.mxu1 %v6201_v16  ;;  %v6865_v16 = vld [vmem:[#allocation9 + $0x8] sm:$0xf] }
 0x1ce   :  { %2383 = vmatprep.subr.bf16.mxu1 %v6209_v17  ;;  %v6278_v17 = vld [vmem:[#allocation10 + $0x34c] ss:$12 sps:$4 sm:$0xff]  }
 0x1cf   :  { %4459 = vmatpush1.bf16.msra.mxu0 %v6246_v21  ;;  %v423_v21 = vrot.slane %v6865_v16, %v6827_v6 }
 0x1d0   :  { %4460 = vmatprep.subr.bf16.mxu0 %v6253_v23  ;;  %v6283_v23 = vld [vmem:[#allocation10 + $0x364] ss:$12 sps:$4 sm:$0xff]  }
 0x1d1   :  { %2384 = vmatpush1.bf16.msra.mxu1 %v6207_v20  ;;  %v419_v20 = vrot.slane %v6865_v16, %v6824_v44 }
 0x1d2   :  { %2385 = vmatprep.subr.bf16.mxu1 %v6215_v22  ;;  %v6276_v22 = vld [vmem:[#allocation10 + $0x348] ss:$12 sps:$4 sm:$0xff]  }
 0x1d3   :  { %4461 = vmatpush1.bf16.msra.mxu0 %v6251_v24 }
 0x1d4   :  { %4462 = vmatprep.subr.bf16.mxu0 %v6258_v26 }
 0x1d5   :  { %2386 = vmatpush1.bf16.msra.mxu1 %v6213_v25  ;;  %v6284_v25 = vld [vmem:[#allocation10 + $0x1d0] ss:$12 sps:$4 sm:$0xff]  }
 0x1d6   :  { %2387 = vmatprep.subr.bf16.mxu1 %v6221_v27 }
 0x1d7   :  { %4463 = vmatpush1.bf16.msra.mxu0 %v6256_v29  ;;  %v6285_v29 = vld [vmem:[#allocation10 + $0x2a8] ss:$12 sps:$4 sm:$0xff]  }
 0x1d8   :  { %4475 = vmatprep.subr.bf16.mxu0 %v6263_v31 }
 0x1d9   :  { %2388 = vmatpush1.bf16.msra.mxu1 %v6219_v30 }
 0x1da   :  { %5497 = vmatprep.subr.bf16.mxu1 %v6225_v32  ;;  %v6281_v32 = vld [vmem:[#allocation10 + $0x360] ss:$12 sps:$4 sm:$0xff]  }
 0x1dc   :  { %2406 = vmatmul.mubr.bf16.vlgmr.msra.gmra.mrb[12].mxu1 %v6815_v34  ;;  %v398_v34 = vsub.s32 3, %v6819_v40 }
 0x1dd   :  { %5498 = vmatpush3.bf16.msra.mxu1 %v6229_v33  ;;  %4679 = vmatprep.mubr.bf16.mxu1 %v6835_v18  ;;  %v6250_v18 = vld [vmem:[#allocation10 + $0x140] ss:$12 sps:$4 sm:$0xff]  }
 0x1de   :  { %5499 = vmatprep.subr.bf16.mxu1 %v6230_v35  ;;  %v399_v47 = vrot.slane %v6821_v43, %v398_v34  ;;  %v6264_v43 = vld [vmem:[#allocation10 + $0xb0] ss:$12 sps:$4 sm:$0xff]  }
 0x1e1   :  { %5500 = vmatpush3.bf16.msra.mxu1 %v6234_v36 }
 0x1e2   :  { %5501 = vmatprep.subr.bf16.mxu1 %v6235_v37  ;;  %v6288_v37 = vld [vmem:[#allocation10 + $0x37c] ss:$12 sps:$4 sm:$0xff]  }
 0x1e5   :  { %5502 = vmatpush3.bf16.msra.mxu1 %v6239_v28 }
 0x1e6   :  { %5503 = vmatprep.subr.bf16.mxu1 %v6240_v38 }
 0x1e9   :  { %5504 = vmatpush3.bf16.msra.mxu1 %v6244_v39  ;;  %v6289_v39 = vld [vmem:[#allocation10 + $0x1e8] ss:$12 sps:$4 sm:$0xff]  }
 0x1ea   :  { %5505 = vmatprep.subr.bf16.mxu1 %v6245_v41 }
 0x1ed   :  { %5506 = vmatpush3.bf16.msra.mxu1 %v6249_v45  ;;  %v6290_v45 = vld [vmem:[#allocation10 + $0x2c0] ss:$12 sps:$4 sm:$0xff]  }
 0x1ee   :  { %5507 = vmatprep.subr.bf16.mxu1 %v6250_v18 }
 0x1ef   :  { %v2063_v52 = vpop.f32.mrb[4].mxu1 }
 0x1f0   :  { %v5633_v53 = vadd.f32 %v2063_v52, %v395_v46  ;;  %v2065_v54 = vpop.f32.mrb[5].mxu1  ;;  %v6294_v52 = vld [vmem:[#allocation10 + $0x200] ss:$12 sps:$4 sm:$0xff]  }
 0x1f1   :  { %v5634_v55 = vadd.f32 %v2065_v54, %v399_v47  ;;  %v2067_v56 = vpop.f32.mrb[6].mxu1  ;;  %5508 = vmatpush3.bf16.msra.mxu1 %v6254_v49  ;;  %v6293_v49 = vld [vmem:[#allocation10 + $0x394] ss:$12 sps:$4 sm:$0xff]   ;;  %v6291_v54 = vld [vmem:[#allocation10 + $0x390] ss:$12 sps:$4 sm:$0xff]  }
 0x1f2   :  { %v5635_v59 = vadd.f32 %v2067_v56, %v395_v46  ;;  %v2069_v60 = vpop.f32.mrb[7].mxu1  ;;  %5509 = vmatprep.subr.bf16.mxu1 %v6255_v50  ;;  %v2418_v0 = vmax.f32 %v5633_v53, 0.0  ;;  %v6286_v46 = vld [vmem:[#allocation10 + $0x378] ss:$12 sps:$4 sm:$0xff]  }
 0x1f3   :  { %v5636_v62 = vadd.f32 %v2069_v60, %v399_v47  ;;  %v2419_v2 = vmax.f32 %v5634_v55, 0.0  ;;  %v6295_v53 = vld [vmem:[#allocation10 + $0x2d8] ss:$12 sps:$4 sm:$0xff]  }
 0x1f4   :  { %v2430_v1 = vmax.f32 %v5635_v59, 0.0  ;;  %v6298_v55 = vld [vmem:[#allocation10 + $0x3ac] ss:$12 sps:$4 sm:$0xff]   ;;  %v6296_v59 = vld [vmem:[#allocation10 + $0x3a8] ss:$12 sps:$4 sm:$0xff]  }
 0x1f5   :  { %v2431_v3 = vmax.f32 %v5636_v62, 0.0  ;;  %5510 = vmatpush3.bf16.msra.mxu1 %v6259_v58  ;;  %v6299_v56 = vld [vmem:[#allocation10 + $0x218] ss:$12 sps:$4 sm:$0xff]   ;;  %v6300_v58 = vld [vmem:[#allocation10 + $0x2f0] ss:$12 sps:$4 sm:$0xff]  }
 0x1f6   :  { %v6860_v4 = vpack.c.bf16 %v2430_v1, %v2418_v0  ;;  %5511 = vmatprep.subr.bf16.mxu1 %v6260_v61  ;;  %v2321_v24 = vpop.f32.mrb[4].mxu0  ;;  %v6303_v60 = vld [vmem:[#allocation10 + $0x3c4] ss:$12 sps:$4 sm:$0xff]   ;;  %v6305_v62 = vld [vmem:[#allocation10 + $0x3c8] ss:$12 sps:$4 sm:$0xff]  }
 0x1f7   :  { %v2443_v8 = vpack.c.bf16 %v2431_v3, %v2419_v2  ;;  %v5645_v26 = vadd.f32 %v2321_v24, %v419_v20  ;;  %v2323_v27 = vpop.f32.mrb[5].mxu0  ;;  %v6304_v61 = vld [vmem:[#allocation10 + $0x230] ss:$12 sps:$4 sm:$0xff]   ;;  %v6301_v0 = vld [vmem:[#allocation10 + $0x3c0] ss:$12 sps:$4 sm:$0xff]  }
 0x1f8   :  { %v5646_v30 = vadd.f32 %v2323_v27, %v423_v21  ;;  %v2325_v31 = vpop.f32.mrb[6].mxu0  ;;  %v6308_v1 = vld [vmem:[#allocation10 + $0x3dc] ss:$12 sps:$4 sm:$0xff]   ;;  %v6310_v3 = vld [vmem:[#allocation10 + $0x3e0] ss:$12 sps:$4 sm:$0xff]  }
 0x1f9   :  { %4464 = vmatprep.mubr.bf16.mxu0 %v2443_v8  ;;  %5512 = vmatpush3.bf16.msra.mxu1 %v6264_v43  ;;  %v2424_v33 = vmax.f32 %v5645_v26, 0.0  ;;  %v5647_v35 = vadd.f32 %v2325_v31, %v419_v20  ;;  %v2327_v36 = vpop.f32.mrb[7].mxu0  ;;  %v6309_v2 = vld [vmem:[#allocation10 + $0x308] ss:$12 sps:$4 sm:$0xff]   ;;  %v6306_v43 = vld [vmem:[#allocation10 + $0x3d8] ss:$12 sps:$4 sm:$0xff]  }
 0x1fa   :  { %4465 = vmatmul.mubr.bf16.vlgmr.msra.gmra.mrb[8].mxu0 %v6860_v4  ;;  %5519 = vmatprep.subr.bf16.mxu1 %v6265_v5  ;;  %v2425_v28 = vmax.f32 %v5646_v30, 0.0  ;;  %v5648_v38 = vadd.f32 %v2327_v36, %v423_v21  ;;  %v6313_v5 = vld [vmem:[#allocation10 + $0x3f4] ss:$12 sps:$4 sm:$0xff]   ;;  %v6326_v20 = vld [vmem:[#allocation10 + $0x438] ss:$12 sps:$4 sm:$0xff]  }
 0x1fb   :  { %4476 = vmatpush1.bf16.msra.mxu0 %v6261_v9  ;;  %4507 = vmatprep.mubr.bf16.mxu0 %v6845_v51  ;;  %v2436_v41 = vmax.f32 %v5647_v35, 0.0  ;;  %v6315_v9 = vld [vmem:[#allocation10 + $0x3f8] ss:$12 sps:$4 sm:$0xff]   ;;  %v6334_v21 = vld [vmem:[#allocation10 + $0x380] ss:$12 sps:$4 sm:$0xff]  }
 0x1fc   :  { %4680 = vmatmul.mubr.bf16.vlgmr.msra.gmra.mrb[16].mxu1 %v6833_v57  ;;  %4477 = vmatprep.subr.bf16.mxu0 %v6268_v10  ;;  %v6280_v57 = vld [vmem:[#allocation10 + $0x290] ss:$12 sps:$4 sm:$0xff]   ;;  %v2437_v18 = vmax.f32 %v5648_v38, 0.0  ;;  %v6338_v24 = vld [vmem:[#allocation10 + $0x46c] ss:$12 sps:$4 sm:$0xff]  }
 0x1fd   :  { %5520 = vmatpush3.bf16.msra.mxu1 %v6269_v11  ;;  %4720 = vmatprep.mubr.bf16.mxu1 %v2443_v8  ;;  %v6871_v47 = vpack.c.bf16 %v2436_v41, %v2424_v33  ;;  %v6314_v8 = vld [vmem:[#allocation10 + $0x320] ss:$12 sps:$4 sm:$0xff]   ;;  %v6311_v10 = vld [vmem:[#allocation10 + $0x3f0] ss:$12 sps:$4 sm:$0xff]   ;;  %v6336_v27 = vld [vmem:[#allocation10 + $0x468] ss:$12 sps:$4 sm:$0xff]  }
 0x1fe   :  { %5521 = vmatprep.subr.bf16.mxu1 %v6270_v12  ;;  %v6873_v50 = vpack.c.bf16 %v2437_v18, %v2425_v28  ;;  %v6318_v11 = vld [vmem:[#allocation10 + $0x40c] ss:$12 sps:$4 sm:$0xff]   ;;  %v6340_v26 = vld [vmem:[#allocation10 + $0x470] ss:$12 sps:$4 sm:$0xff]   ;;  %v6345_v31 = vld [vmem:[#allocation10 + $0x548] ss:$12 sps:$4 sm:$0xff]  }
 0x1ff   :  { %4478 = vmatpush1.bf16.msra.mxu0 %v6266_v13  ;;  %v6319_v12 = vld [vmem:[#allocation10 + $0x338] ss:$12 sps:$4 sm:$0xff]   ;;  %v6320_v13 = vld [vmem:[#allocation10 + $0x410] ss:$12 sps:$4 sm:$0xff]   ;;  %v6349_v35 = vld [vmem:[#allocation10 + $0x488] ss:$12 sps:$4 sm:$0xff]  }
 0x200   :  { %4479 = vmatprep.subr.bf16.mxu0 %v6273_v14  ;;  %v6316_v14 = vld [vmem:[#allocation10 + $0x408] ss:$12 sps:$4 sm:$0xff]   ;;  %v6344_v30 = vld [vmem:[#allocation10 + $0x3b0] ss:$12 sps:$4 sm:$0xff]   ;;  %v6350_v36 = vld [vmem:[#allocation10 + $0x560] ss:$12 sps:$4 sm:$0xff]  }
 0x201   :  { %5522 = vmatpush3.bf16.msra.mxu1 %v6274_v7  ;;  %v6324_v7 = vld [vmem:[#allocation10 + $0x350] ss:$12 sps:$4 sm:$0xff]   ;;  %v6353_v28 = vld [vmem:[#allocation10 + $0x4b4] ss:$12 sps:$4 sm:$0xff]   ;;  %v6359_v18 = vld [vmem:[#allocation10 + $0x4b8] ss:$12 sps:$4 sm:$0xff]  }
 0x202   :  { %5523 = vmatprep.subr.bf16.mxu1 %v6275_v15  ;;  %v6325_v15 = vld [vmem:[#allocation10 + $0x428] ss:$12 sps:$4 sm:$0xff]   ;;  %v6354_v38 = vld [vmem:[#allocation10 + $0x4a0] ss:$12 sps:$4 sm:$0xff]   ;;  %v6351_v41 = vld [vmem:[#allocation10 + $0x4b0] ss:$12 sps:$4 sm:$0xff]  }
 0x203   :  { %4480 = vmatpush1.bf16.msra.mxu0 %v6271_v63  ;;  %v6328_v63 = vld [vmem:[#allocation10 + $0x43c] ss:$12 sps:$4 sm:$0xff]  }
 0x204   :  { %4481 = vmatprep.subr.bf16.mxu0 %v6278_v17  ;;  %v6329_v17 = vld [vmem:[#allocation10 + $0x368] ss:$12 sps:$4 sm:$0xff]  }
 0x205   :  { %5524 = vmatpush3.bf16.msra.mxu1 %v6279_v19  ;;  %v6330_v19 = vld [vmem:[#allocation10 + $0x440] ss:$12 sps:$4 sm:$0xff]   ;;  %v6348_v33 = vld [vmem:[#allocation10 + $0x49c] ss:$12 sps:$4 sm:$0xff]  }
 0x206   :  { %5525 = vmatprep.subr.bf16.mxu1 %v6280_v57  ;;  %v6333_v57 = vld [vmem:[#allocation10 + $0x454] ss:$12 sps:$4 sm:$0xff]  }
 0x207   :  { %4482 = vmatpush1.bf16.msra.mxu0 %v6276_v22  ;;  %v6335_v22 = vld [vmem:[#allocation10 + $0x458] ss:$12 sps:$4 sm:$0xff]  }
 0x208   :  { %4483 = vmatprep.subr.bf16.mxu0 %v6283_v23  ;;  %v6331_v23 = vld [vmem:[#allocation10 + $0x450] ss:$12 sps:$4 sm:$0xff]  }
 0x209   :  { %5526 = vmatpush3.bf16.msra.mxu1 %v6284_v25  ;;  %v6339_v25 = vld [vmem:[#allocation10 + $0x398] ss:$12 sps:$4 sm:$0xff]  }
 0x20a   :  { %5527 = vmatprep.subr.bf16.mxu1 %v6285_v29  ;;  %v6343_v29 = vld [vmem:[#allocation10 + $0x484] ss:$12 sps:$4 sm:$0xff]  }
 0x20b   :  { %4484 = vmatpush1.bf16.msra.mxu0 %v6281_v32  ;;  %v6341_v32 = vld [vmem:[#allocation10 + $0x480] ss:$12 sps:$4 sm:$0xff]  }
 0x20c   :  { %4485 = vmatprep.subr.bf16.mxu0 %v6288_v37  ;;  %v6346_v37 = vld [vmem:[#allocation10 + $0x498] ss:$12 sps:$4 sm:$0xff]  }
 0x20d   :  { %5528 = vmatpush3.bf16.msra.mxu1 %v6289_v39  ;;  %v6355_v39 = vld [vmem:[#allocation10 + $0x578] ss:$12 sps:$4 sm:$0xff]  }
 0x20e   :  { %5529 = vmatprep.subr.bf16.mxu1 %v6290_v45  ;;  %v6358_v45 = vld [vmem:[#allocation10 + $0x4cc] ss:$12 sps:$4 sm:$0xff]  }
 0x20f   :  { %4486 = vmatpush1.bf16.msra.mxu0 %v6286_v46  ;;  %v6360_v46 = vld [vmem:[#allocation10 + $0x590] ss:$12 sps:$4 sm:$0xff]  }
 0x210   :  { %4487 = vmatprep.subr.bf16.mxu0 %v6293_v49  ;;  %v6356_v49 = vld [vmem:[#allocation10 + $0x4c8] ss:$12 sps:$4 sm:$0xff]  }
 0x211   :  { %5530 = vmatpush3.bf16.msra.mxu1 %v6294_v52  ;;  %v6363_v52 = vld [vmem:[#allocation10 + $0x4e4] ss:$12 sps:$4 sm:$0xff]  }
 0x212   :  { %5531 = vmatprep.subr.bf16.mxu1 %v6295_v53  ;;  %v6365_v53 = vld [vmem:[#allocation10 + $0x5a8] ss:$12 sps:$4 sm:$0xff]  }
 0x213   :  { %4488 = vmatpush1.bf16.msra.mxu0 %v6291_v54  ;;  %v6361_v54 = vld [vmem:[#allocation10 + $0x4e0] ss:$12 sps:$4 sm:$0xff]  }
 0x214   :  { %4489 = vmatprep.subr.bf16.mxu0 %v6298_v55  ;;  %v6368_v55 = vld [vmem:[#allocation10 + $0x4fc] ss:$12 sps:$4 sm:$0xff]  }
 0x215   :  { %5532 = vmatpush3.bf16.msra.mxu1 %v6299_v56  ;;  %v410_v56 = vsub.s32 6, %v6819_v40 }
 0x216   :  { %5533 = vmatprep.subr.bf16.mxu1 %v6300_v58  ;;  %v6369_v58 = vld [vmem:[#allocation10 + $0x4e8] ss:$12 sps:$4 sm:$0xff]  }
 0x217   :  { %4490 = vmatpush1.bf16.msra.mxu0 %v6296_v59  ;;  %v414_v59 = vsub.s32 7, %v6819_v40  ;;  %v6488_v40 = vld [vmem:[#allocation10 + $0x784] ss:$12 sps:$4 sm:$0xff]  }
 0x218   :  { %4491 = vmatprep.subr.bf16.mxu0 %v6303_v60  ;;  %v6370_v60 = vld [vmem:[#allocation10 + $0x5c0] ss:$12 sps:$4 sm:$0xff]  }
 0x219   :  { %5534 = vmatpush3.bf16.msra.mxu1 %v6304_v61  ;;  %v6366_v61 = vld [vmem:[#allocation10 + $0x4f8] ss:$12 sps:$4 sm:$0xff]  }
 0x21a   :  { %5541 = vmatprep.subr.bf16.mxu1 %v6305_v62  ;;  %v6537_v62 = vld [vmem:[#allocation9] sm:$0xff] }
 0x21b   :  { %4492 = vmatpush1.bf16.msra.mxu0 %v6301_v0  ;;  %v411_v0 = vrot.slane %v6537_v62, %v410_v56  ;;  %v6415_v56 = vld [vmem:[#allocation10 + $0x758] ss:$12 sps:$4 sm:$0xff]  }
 0x21c   :  { %4721 = vmatmul.mubr.bf16.vlgmr.msra.gmra.mrb[20].mxu1 %v6860_v4  ;;  %4493 = vmatprep.subr.bf16.mxu0 %v6308_v1  ;;  %v6323_v4 = vld [vmem:[#allocation10 + $0x424] ss:$12 sps:$4 sm:$0xff]   ;;  %v6373_v1 = vld [vmem:[#allocation10 + $0x514] ss:$12 sps:$4 sm:$0xff]  }
 0x21d   :  { %5542 = vmatpush3.bf16.msra.mxu1 %v6309_v2  ;;  %4761 = vmatprep.mubr.bf16.mxu1 %v6845_v51  ;;  %v6321_v51 = vld [vmem:[#allocation10 + $0x420] ss:$12 sps:$4 sm:$0xff]   ;;  %v415_v2 = vrot.slane %v6537_v62, %v414_v59  ;;  %v6416_v62 = vld [vmem:[#allocation10 + $0x5e8] ss:$12 sps:$4 sm:$0xff]  }
 0x21e   :  { %5543 = vmatprep.subr.bf16.mxu1 %v6310_v3  ;;  %v6374_v3 = vld [vmem:[#allocation10 + $0x500] ss:$12 sps:$4 sm:$0xff]  }
 0x21f   :  { %4494 = vmatpush1.bf16.msra.mxu0 %v6306_v43  ;;  %v6375_v43 = vld [vmem:[#allocation10 + $0x5d8] ss:$12 sps:$4 sm:$0xff]  }
 0x220   :  { %4495 = vmatprep.subr.bf16.mxu0 %v6313_v5  ;;  %v6418_v59 = vld [vmem:[#allocation10 + $0x5ec] ss:$12 sps:$4 sm:$0xff]  }
 0x221   :  { %5544 = vmatpush3.bf16.msra.mxu1 %v6314_v8  ;;  %v6371_v8 = vld [vmem:[#allocation10 + $0x510] ss:$12 sps:$4 sm:$0xff]  }
 0x222   :  { %5545 = vmatprep.subr.bf16.mxu1 %v6315_v9 }
 0x223   :  { %4496 = vmatpush1.bf16.msra.mxu0 %v6311_v10 }
 0x224   :  { %4497 = vmatprep.subr.bf16.mxu0 %v6318_v11  ;;  %v6378_v11 = vld [vmem:[#allocation10 + $0x52c] ss:$12 sps:$4 sm:$0xff]  }
 0x225   :  { %5546 = vmatpush3.bf16.msra.mxu1 %v6319_v12 }
 0x226   :  { %5547 = vmatprep.subr.bf16.mxu1 %v6320_v13 }
 0x227   :  { %4498 = vmatpush1.bf16.msra.mxu0 %v6316_v14  ;;  %v6379_v14 = vld [vmem:[#allocation10 + $0x518] ss:$12 sps:$4 sm:$0xff]  }
 0x228   :  { %4499 = vmatprep.subr.bf16.mxu0 %v6323_v4 }
 0x229   :  { %5548 = vmatpush3.bf16.msra.mxu1 %v6324_v7 }
 0x22a   :  { %5549 = vmatprep.subr.bf16.mxu1 %v6325_v15 }
 0x22b   :  { %4500 = vmatpush1.bf16.msra.mxu0 %v6321_v51  ;;  %v6380_v51 = vld [vmem:[#allocation10 + $0x5f0] ss:$12 sps:$4 sm:$0xff]  }
 0x22c   :  { %4501 = vmatprep.subr.bf16.mxu0 %v6328_v63 }
 0x22d   :  { %5550 = vmatpush3.bf16.msra.mxu1 %v6329_v17  ;;  %v6376_v17 = vld [vmem:[#allocation10 + $0x528] ss:$12 sps:$4 sm:$0xff]  }
 0x22e   :  { %5551 = vmatprep.subr.bf16.mxu1 %v6330_v19 }
 0x22f   :  { %4502 = vmatpush1.bf16.msra.mxu0 %v6326_v20  ;;  %v6383_v20 = vld [vmem:[#allocation10 + $0x544] ss:$12 sps:$4 sm:$0xff]  }
 0x230   :  { %4503 = vmatprep.subr.bf16.mxu0 %v6333_v57 }
 0x231   :  { %5552 = vmatpush3.bf16.msra.mxu1 %v6334_v21 }
 0x232   :  { %5553 = vmatprep.subr.bf16.mxu1 %v6335_v22  ;;  %v6384_v22 = vld [vmem:[#allocation10 + $0x530] ss:$12 sps:$4 sm:$0xff]  }
 0x233   :  { %4504 = vmatpush1.bf16.msra.mxu0 %v6331_v23 }
 0x234   :  { %4505 = vmatprep.subr.bf16.mxu0 %v6338_v24  ;;  %v6385_v24 = vld [vmem:[#allocation10 + $0x6c8] ss:$12 sps:$4 sm:$0xff]  }
 0x235   :  { %5554 = vmatpush3.bf16.msra.mxu1 %v6339_v25 }
 0x236   :  { %5555 = vmatprep.subr.bf16.mxu1 %v6340_v26  ;;  %v6381_v26 = vld [vmem:[#allocation10 + $0x540] ss:$12 sps:$4 sm:$0xff]  }
 0x237   :  { %4506 = vmatpush1.bf16.msra.mxu0 %v6336_v27  ;;  %v6388_v27 = vld [vmem:[#allocation10 + $0x55c] ss:$12 sps:$4 sm:$0xff]  }
 0x238   :  { %4518 = vmatprep.subr.bf16.mxu0 %v6343_v29  ;;  %v6389_v29 = vld [vmem:[#allocation10 + $0x608] ss:$12 sps:$4 sm:$0xff]  }
 0x239   :  { %5556 = vmatpush3.bf16.msra.mxu1 %v6344_v30  ;;  %v6390_v30 = vld [vmem:[#allocation10 + $0x6e0] ss:$12 sps:$4 sm:$0xff]  }
 0x23a   :  { %4508 = vmatmul.mubr.bf16.vlgmr.msra.gmra.mrb[8].mxu0 %v6843_v48  ;;  %5563 = vmatprep.subr.bf16.mxu1 %v6345_v31  ;;  %v6386_v31 = vld [vmem:[#allocation10 + $0x558] ss:$12 sps:$4 sm:$0xff]  }
 0x23b   :  { %4519 = vmatpush1.bf16.msra.mxu0 %v6341_v32  ;;  %v6393_v32 = vld [vmem:[#allocation10 + $0x574] ss:$12 sps:$4 sm:$0xff]  }
 0x23c   :  { %4762 = vmatmul.mubr.bf16.vlgmr.msra.gmra.mrb[24].mxu1 %v6843_v48  ;;  %4520 = vmatprep.subr.bf16.mxu0 %v6348_v33  ;;  %v6364_v48 = vld [vmem:[#allocation10 + $0x4d0] ss:$12 sps:$4 sm:$0xff]   ;;  %v6394_v33 = vld [vmem:[#allocation10 + $0x620] ss:$12 sps:$4 sm:$0xff]  }
 0x23d   :  { %5564 = vmatpush3.bf16.msra.mxu1 %v6349_v35  ;;  %v6395_v35 = vld [vmem:[#allocation10 + $0x6f8] ss:$12 sps:$4 sm:$0xff]  }
 0x23e   :  { %5565 = vmatprep.subr.bf16.mxu1 %v6350_v36  ;;  %v6391_v36 = vld [vmem:[#allocation10 + $0x570] ss:$12 sps:$4 sm:$0xff]  }
 0x23f   :  { %4521 = vmatpush1.bf16.msra.mxu0 %v6346_v37  ;;  %v6398_v37 = vld [vmem:[#allocation10 + $0x58c] ss:$12 sps:$4 sm:$0xff]  }
 0x240   :  { %4522 = vmatprep.subr.bf16.mxu0 %v6353_v28  ;;  %v6399_v28 = vld [vmem:[#allocation10 + $0x638] ss:$12 sps:$4 sm:$0xff]  }
 0x241   :  { %5566 = vmatpush3.bf16.msra.mxu1 %v6354_v38  ;;  %v6400_v38 = vld [vmem:[#allocation10 + $0x710] ss:$12 sps:$4 sm:$0xff]  }
 0x242   :  { %5567 = vmatprep.subr.bf16.mxu1 %v6355_v39  ;;  %v6396_v39 = vld [vmem:[#allocation10 + $0x588] ss:$12 sps:$4 sm:$0xff]  }
 0x243   :  { %4523 = vmatpush1.bf16.msra.mxu0 %v6351_v41  ;;  %v6403_v41 = vld [vmem:[#allocation10 + $0x5a4] ss:$12 sps:$4 sm:$0xff]  }
 0x244   :  { %4524 = vmatprep.subr.bf16.mxu0 %v6358_v45  ;;  %v6404_v45 = vld [vmem:[#allocation10 + $0x650] ss:$12 sps:$4 sm:$0xff]  }
 0x245   :  { %5568 = vmatpush3.bf16.msra.mxu1 %v6359_v18  ;;  %v6405_v18 = vld [vmem:[#allocation10 + $0x728] ss:$12 sps:$4 sm:$0xff]  }
 0x246   :  { %5569 = vmatprep.subr.bf16.mxu1 %v6360_v46  ;;  %v6401_v46 = vld [vmem:[#allocation10 + $0x5a0] ss:$12 sps:$4 sm:$0xff]  }
 0x247   :  { %4525 = vmatpush1.bf16.msra.mxu0 %v6356_v49  ;;  %v6408_v49 = vld [vmem:[#allocation10 + $0x5bc] ss:$12 sps:$4 sm:$0xff]  }
 0x248   :  { %4526 = vmatprep.subr.bf16.mxu0 %v6363_v52  ;;  %v6409_v52 = vld [vmem:[#allocation10 + $0x668] ss:$12 sps:$4 sm:$0xff]  }
 0x249   :  { %5570 = vmatpush3.bf16.msra.mxu1 %v6364_v48  ;;  %v6410_v48 = vld [vmem:[#allocation10 + $0x740] ss:$12 sps:$4 sm:$0xff]  }
 0x24a   :  { %5571 = vmatprep.subr.bf16.mxu1 %v6365_v53  ;;  %v6406_v53 = vld [vmem:[#allocation10 + $0x5b8] ss:$12 sps:$4 sm:$0xff]  }
 0x24b   :  { %4527 = vmatpush1.bf16.msra.mxu0 %v6361_v54  ;;  %v6413_v54 = vld [vmem:[#allocation10 + $0x5d4] ss:$12 sps:$4 sm:$0xff]  }
 0x24c   :  { %4528 = vmatprep.subr.bf16.mxu0 %v6368_v55  ;;  %v6414_v55 = vld [vmem:[#allocation10 + $0x680] ss:$12 sps:$4 sm:$0xff]  }
 0x24d   :  { %5572 = vmatpush3.bf16.msra.mxu1 %v6369_v58  ;;  %v6411_v58 = vld [vmem:[#allocation10 + $0x5d0] ss:$12 sps:$4 sm:$0xff]  }
 0x24e   :  { %5573 = vmatprep.subr.bf16.mxu1 %v6370_v60  ;;  %v6419_v60 = vld [vmem:[#allocation10 + $0x698] ss:$12 sps:$4 sm:$0xff]  }
 0x24f   :  { %4529 = vmatpush1.bf16.msra.mxu0 %v6366_v61  ;;  %v2235_v5 = vpop.f32.mrb[8].mxu1  ;;  %v6420_v61 = vld [vmem:[#allocation10 + $0x770] ss:$12 sps:$4 sm:$0xff]  }
 0x250   :  { %v5641_v9 = vadd.f32 %v2235_v5, %v411_v0  ;;  %v2237_v10 = vpop.f32.mrb[9].mxu1  ;;  %4530 = vmatprep.subr.bf16.mxu0 %v6373_v1  ;;  %v6424_v1 = vld [vmem:[#allocation10 + $0x6b0] ss:$12 sps:$4 sm:$0xff]   ;;  %v6450_v5 = vld [vmem:[#allocation10 + $0x788] ss:$12 sps:$4 sm:$0xff]  }
 0x251   :  { %v5642_v12 = vadd.f32 %v2237_v10, %v415_v2  ;;  %v2239_v13 = vpop.f32.mrb[10].mxu1  ;;  %5574 = vmatpush3.bf16.msra.mxu1 %v6374_v3  ;;  %v6421_v3 = vld [vmem:[#allocation10 + $0x600] ss:$12 sps:$4 sm:$0xff]  }
 0x252   :  { %v2422_v4 = vmax.f32 %v5641_v9, 0.0  ;;  %v5643_v7 = vadd.f32 %v2239_v13, %v411_v0  ;;  %v2241_v15 = vpop.f32.mrb[11].mxu1  ;;  %5575 = vmatprep.subr.bf16.mxu1 %v6375_v43  ;;  %v6423_v0 = vld [vmem:[#allocation10 + $0x604] ss:$12 sps:$4 sm:$0xff]   ;;  %v6427_v43 = vld [vmem:[#allocation10 + $0x61c] ss:$12 sps:$4 sm:$0xff]  }
 0x253   :  { %v5644_v63 = vadd.f32 %v2241_v15, %v415_v2  ;;  %4531 = vmatpush1.bf16.msra.mxu0 %v6371_v8  ;;  %v2423_v57 = vmax.f32 %v5642_v12, 0.0  ;;  %v6449_v2 = vld [vmem:[#allocation10 + $0x848] ss:$12 sps:$4 sm:$0xff]   ;;  %v6454_v8 = vld [vmem:[#allocation10 + $0x860] ss:$12 sps:$4 sm:$0xff]  }
 0x254   :  { %v2434_v19 = vmax.f32 %v5643_v7, 0.0  ;;  %4532 = vmatprep.subr.bf16.mxu0 %v6378_v11  ;;  %v6425_v9 = vld [vmem:[#allocation10 + $0x618] ss:$12 sps:$4 sm:$0xff]   ;;  %v6430_v10 = vld [vmem:[#allocation10 + $0x634] ss:$12 sps:$4 sm:$0xff]  }
 0x255   :  { %v2435_v21 = vmax.f32 %v5644_v63, 0.0  ;;  %5576 = vmatpush3.bf16.msra.mxu1 %v6379_v14  ;;  %v6455_v11 = vld [vmem:[#allocation10 + $0x7a0] ss:$12 sps:$4 sm:$0xff]   ;;  %v6459_v12 = vld [vmem:[#allocation10 + $0x878] ss:$12 sps:$4 sm:$0xff]  }
 0x256   :  { %v6881_v23 = vpack.c.bf16 %v2434_v19, %v2422_v4  ;;  %5577 = vmatprep.subr.bf16.mxu1 %v6380_v51  ;;  %v6428_v13 = vld [vmem:[#allocation10 + $0x630] ss:$12 sps:$4 sm:$0xff]   ;;  %v6433_v14 = vld [vmem:[#allocation10 + $0x64c] ss:$12 sps:$4 sm:$0xff]   ;;  %v6431_v15 = vld [vmem:[#allocation10 + $0x648] ss:$12 sps:$4 sm:$0xff]  }
 0x257   :  { %v2447_v25 = vpack.c.bf16 %v2435_v21, %v2423_v57  ;;  %4533 = vmatpush1.bf16.msra.mxu0 %v6376_v17  ;;  %v6460_v4 = vld [vmem:[#allocation10 + $0x7b8] ss:$12 sps:$4 sm:$0xff]   ;;  %v6464_v7 = vld [vmem:[#allocation10 + $0x890] ss:$12 sps:$4 sm:$0xff]   ;;  %v6469_v63 = vld [vmem:[#allocation10 + $0x8a8] ss:$12 sps:$4 sm:$0xff]  }
 0x258   :  { %4534 = vmatprep.subr.bf16.mxu0 %v6383_v20  ;;  %v6465_v51 = vld [vmem:[#allocation10 + $0x7d0] ss:$12 sps:$4 sm:$0xff]   ;;  %v6434_v17 = vld [vmem:[#allocation10 + $0x660] ss:$12 sps:$4 sm:$0xff]   ;;  %v6470_v20 = vld [vmem:[#allocation10 + $0x7e8] ss:$12 sps:$4 sm:$0xff]  }
 0x259   :  { %4550 = vmatprep.mubr.bf16.mxu0 %v2447_v25  ;;  %5578 = vmatpush3.bf16.msra.mxu1 %v6384_v22  ;;  %v6439_v19 = vld [vmem:[#allocation10 + $0x67c] ss:$12 sps:$4 sm:$0xff]   ;;  %v6474_v57 = vld [vmem:[#allocation10 + $0x8c0] ss:$12 sps:$4 sm:$0xff]   ;;  %v6437_v21 = vld [vmem:[#allocation10 + $0x678] ss:$12 sps:$4 sm:$0xff]  }
 0x25a   :  { %4802 = vmatprep.mubr.bf16.mxu1 %v2447_v25  ;;  %5585 = vmatprep.subr.bf16.mxu1 %v6385_v24  ;;  %v6442_v22 = vld [vmem:[#allocation10 + $0x694] ss:$12 sps:$4 sm:$0xff]   ;;  %v6479_v24 = vld [vmem:[#allocation10 + $0x8d8] ss:$12 sps:$4 sm:$0xff]   ;;  %v6440_v25 = vld [vmem:[#allocation10 + $0x690] ss:$12 sps:$4 sm:$0xff]  }
 0x25b   :  { %4535 = vmatpush1.bf16.msra.mxu0 %v6381_v26  ;;  %v6445_v26 = vld [vmem:[#allocation10 + $0x6ac] ss:$12 sps:$4 sm:$0xff]  }
 0x25c   :  { %4803 = vmatmul.mubr.bf16.vlgmr.msra.gmra.mrb[28].mxu1 %v6881_v23  ;;  %4536 = vmatprep.subr.bf16.mxu0 %v6388_v27  ;;  %v6480_v27 = vld [vmem:[#allocation10 + $0x818] ss:$12 sps:$4 sm:$0xff]  }
 0x25d   :  { %5586 = vmatpush3.bf16.msra.mxu1 %v6389_v29  ;;  %4843 = vmatprep.mubr.bf16.mxu1 %v6873_v50  ;;  %v6484_v29 = vld [vmem:[#allocation10 + $0x8f0] ss:$12 sps:$4 sm:$0xff]  }
 0x25e   :  { %5587 = vmatprep.subr.bf16.mxu1 %v6390_v30  ;;  %v6443_v30 = vld [vmem:[#allocation10 + $0x6a8] ss:$12 sps:$4 sm:$0xff]  }
 0x25f   :  { %4537 = vmatpush1.bf16.msra.mxu0 %v6386_v31  ;;  %v6448_v31 = vld [vmem:[#allocation10 + $0x6c4] ss:$12 sps:$4 sm:$0xff]  }
 0x260   :  { %4538 = vmatprep.subr.bf16.mxu0 %v6393_v32  ;;  %v6485_v32 = vld [vmem:[#allocation10 + $0x830] ss:$12 sps:$4 sm:$0xff]  }
 0x261   :  { %5588 = vmatpush3.bf16.msra.mxu1 %v6394_v33  ;;  %v6446_v33 = vld [vmem:[#allocation10 + $0x6c0] ss:$12 sps:$4 sm:$0xff]  }
 0x262   :  { %5589 = vmatprep.subr.bf16.mxu1 %v6395_v35  ;;  %v6453_v35 = vld [vmem:[#allocation10 + $0x6dc] ss:$12 sps:$4 sm:$0xff]  }
 0x263   :  { %4539 = vmatpush1.bf16.msra.mxu0 %v6391_v36  ;;  %v6451_v36 = vld [vmem:[#allocation10 + $0x6d8] ss:$12 sps:$4 sm:$0xff]  }
 0x264   :  { %4540 = vmatprep.subr.bf16.mxu0 %v6398_v37  ;;  %v6458_v37 = vld [vmem:[#allocation10 + $0x6f4] ss:$12 sps:$4 sm:$0xff]  }
 0x265   :  { %5590 = vmatpush3.bf16.msra.mxu1 %v6399_v28  ;;  %v6456_v28 = vld [vmem:[#allocation10 + $0x6f0] ss:$12 sps:$4 sm:$0xff]  }
 0x266   :  { %5591 = vmatprep.subr.bf16.mxu1 %v6400_v38  ;;  %v6463_v38 = vld [vmem:[#allocation10 + $0x70c] ss:$12 sps:$4 sm:$0xff]  }
 0x267   :  { %4541 = vmatpush1.bf16.msra.mxu0 %v6396_v39  ;;  %v6461_v39 = vld [vmem:[#allocation10 + $0x708] ss:$12 sps:$4 sm:$0xff]  }
 0x268   :  { %4542 = vmatprep.subr.bf16.mxu0 %v6403_v41  ;;  %v6468_v41 = vld [vmem:[#allocation10 + $0x724] ss:$12 sps:$4 sm:$0xff]  }
 0x269   :  { %5592 = vmatpush3.bf16.msra.mxu1 %v6404_v45  ;;  %v6466_v45 = vld [vmem:[#allocation10 + $0x720] ss:$12 sps:$4 sm:$0xff]  }
 0x26a   :  { %5593 = vmatprep.subr.bf16.mxu1 %v6405_v18  ;;  %v6473_v18 = vld [vmem:[#allocation10 + $0x73c] ss:$12 sps:$4 sm:$0xff]  }
 0x26b   :  { %4543 = vmatpush1.bf16.msra.mxu0 %v6401_v46  ;;  %v6471_v46 = vld [vmem:[#allocation10 + $0x738] ss:$12 sps:$4 sm:$0xff]  }
 0x26c   :  { %4544 = vmatprep.subr.bf16.mxu0 %v6408_v49  ;;  %v427_v49 = vrot.slane %v6865_v16, %v6852_v42 }
 0x26d   :  { %5594 = vmatpush3.bf16.msra.mxu1 %v6409_v52  ;;  %v6478_v52 = vld [vmem:[#allocation10 + $0x754] ss:$12 sps:$4 sm:$0xff]  }
 0x26e   :  { %5595 = vmatprep.subr.bf16.mxu1 %v6410_v48  ;;  %v431_v48 = vrot.slane %v6865_v16, %v398_v34 }
 0x26f   :  { %4545 = vmatpush1.bf16.msra.mxu0 %v6406_v53 }
 0x270   :  { %4546 = vmatprep.subr.bf16.mxu0 %v6413_v54  ;;  %v6476_v54 = vld [vmem:[#allocation10 + $0x750] ss:$12 sps:$4 sm:$0xff]  }
 0x271   :  { %5596 = vmatpush3.bf16.msra.mxu1 %v6414_v55 }
 0x272   :  { %5597 = vmatprep.subr.bf16.mxu1 %v6415_v56 }
 0x273   :  { %4547 = vmatpush1.bf16.msra.mxu0 %v6411_v58  ;;  %v6483_v58 = vld [vmem:[#allocation10 + $0x76c] ss:$12 sps:$4 sm:$0xff]  }
 0x274   :  { %4548 = vmatprep.subr.bf16.mxu0 %v6418_v59 }
 0x275   :  { %5598 = vmatpush3.bf16.msra.mxu1 %v6419_v60 }
 0x276   :  { %5599 = vmatprep.subr.bf16.mxu1 %v6420_v61 }
 0x277   :  { %4549 = vmatpush1.bf16.msra.mxu0 %v6416_v62 }
 0x278   :  { %4561 = vmatprep.subr.bf16.mxu0 %v6423_v0 }
 0x279   :  { %5600 = vmatpush3.bf16.msra.mxu1 %v6424_v1 }
 0x27a   :  { %4551 = vmatmul.mubr.bf16.vlgmr.msra.gmra.mrb[8].mxu0 %v6881_v23  ;;  %5607 = vmatprep.subr.bf16.mxu1 %v6449_v2  ;;  %v6475_v23 = vld [vmem:[#allocation10 + $0x800] ss:$12 sps:$4 sm:$0xff]  }
 0x27b   :  { %4562 = vmatpush1.bf16.msra.mxu0 %v6421_v3  ;;  %4593 = vmatprep.mubr.bf16.mxu0 %v6873_v50  ;;  %v6436_v50 = vld [vmem:[#allocation10 + $0x664] ss:$12 sps:$4 sm:$0xff]   ;;  %v6481_v3 = vld [vmem:[#allocation10 + $0x768] ss:$12 sps:$4 sm:$0xff]  }
 0x27c   :  { %4844 = vmatmul.mubr.bf16.vlgmr.msra.gmra.mrb[32].mxu1 %v6871_v47  ;;  %4563 = vmatprep.subr.bf16.mxu0 %v6427_v43 }
 0x27d   :  { %5608 = vmatpush3.bf16.msra.mxu1 %v6450_v5 }
 0x27e   :  { %5609 = vmatprep.subr.bf16.mxu1 %v6454_v8  ;;  %v6486_v8 = vld [vmem:[#allocation10 + $0x780] ss:$12 sps:$4 sm:$0xff]  }
 0x27f   :  { %4564 = vmatpush1.bf16.msra.mxu0 %v6425_v9  ;;  %v6491_v9 = vld [vmem:[#allocation10 + $0x79c] ss:$12 sps:$4 sm:$0xff]  }
 0x280   :  { %4565 = vmatprep.subr.bf16.mxu0 %v6430_v10  ;;  %v6489_v10 = vld [vmem:[#allocation10 + $0x798] ss:$12 sps:$4 sm:$0xff]  }
 0x281   :  { %5610 = vmatpush3.bf16.msra.mxu1 %v6455_v11  ;;  %v6494_v11 = vld [vmem:[#allocation10 + $0x7b4] ss:$12 sps:$4 sm:$0xff]  }
 0x282   :  { %5611 = vmatprep.subr.bf16.mxu1 %v6459_v12  ;;  %v6492_v12 = vld [vmem:[#allocation10 + $0x7b0] ss:$12 sps:$4 sm:$0xff]  }
 0x283   :  { %4566 = vmatpush1.bf16.msra.mxu0 %v6428_v13  ;;  %v6497_v13 = vld [vmem:[#allocation10 + $0x7cc] ss:$12 sps:$4 sm:$0xff]  }
 0x284   :  { %4567 = vmatprep.subr.bf16.mxu0 %v6433_v14  ;;  %v6495_v14 = vld [vmem:[#allocation10 + $0x7c8] ss:$12 sps:$4 sm:$0xff]  }
 0x285   :  { %5612 = vmatpush3.bf16.msra.mxu1 %v6460_v4  ;;  %v6500_v4 = vld [vmem:[#allocation10 + $0x7e4] ss:$12 sps:$4 sm:$0xff]  }
 0x286   :  { %5613 = vmatprep.subr.bf16.mxu1 %v6464_v7  ;;  %v6498_v7 = vld [vmem:[#allocation10 + $0x7e0] ss:$12 sps:$4 sm:$0xff]  }
 0x287   :  { %4568 = vmatpush1.bf16.msra.mxu0 %v6431_v15  ;;  %v6503_v15 = vld [vmem:[#allocation10 + $0x7fc] ss:$12 sps:$4 sm:$0xff]  }
 0x288   :  { %4569 = vmatprep.subr.bf16.mxu0 %v6436_v50  ;;  %v6506_v50 = vld [vmem:[#allocation10 + $0x814] ss:$12 sps:$4 sm:$0xff]  }
 0x289   :  { %5614 = vmatpush3.bf16.msra.mxu1 %v6465_v51 }
 0x28a   :  { %5615 = vmatprep.subr.bf16.mxu1 %v6469_v63  ;;  %v6504_v63 = vld [vmem:[#allocation10 + $0x810] ss:$12 sps:$4 sm:$0xff]  }
 0x28b   :  { %4570 = vmatpush1.bf16.msra.mxu0 %v6434_v17 }
 0x28c   :  { %4571 = vmatprep.subr.bf16.mxu0 %v6439_v19  ;;  %v6509_v19 = vld [vmem:[#allocation10 + $0x82c] ss:$12 sps:$4 sm:$0xff]  }
 0x28d   :  { %5616 = vmatpush3.bf16.msra.mxu1 %v6470_v20 }
 0x28e   :  { %5617 = vmatprep.subr.bf16.mxu1 %v6474_v57 }
 0x28f   :  { %4572 = vmatpush1.bf16.msra.mxu0 %v6437_v21 }
 0x290   :  { %4573 = vmatprep.subr.bf16.mxu0 %v6442_v22 }
 0x291   :  { %5618 = vmatpush3.bf16.msra.mxu1 %v6475_v23  ;;  %v6507_v23 = vld [vmem:[#allocation10 + $0x828] ss:$12 sps:$4 sm:$0xff]  }
 0x292   :  { %5619 = vmatprep.subr.bf16.mxu1 %v6479_v24  ;;  %v6512_v24 = vld [vmem:[#allocation10 + $0x844] ss:$12 sps:$4 sm:$0xff]  }
 0x293   :  { %4574 = vmatpush1.bf16.msra.mxu0 %v6440_v25  ;;  %v6510_v25 = vld [vmem:[#allocation10 + $0x840] ss:$12 sps:$4 sm:$0xff]  }
 0x294   :  { %4575 = vmatprep.subr.bf16.mxu0 %v6445_v26  ;;  %v6515_v26 = vld [vmem:[#allocation10 + $0x85c] ss:$12 sps:$4 sm:$0xff]  }
 0x295   :  { %5620 = vmatpush3.bf16.msra.mxu1 %v6480_v27  ;;  %v6513_v27 = vld [vmem:[#allocation10 + $0x858] ss:$12 sps:$4 sm:$0xff]  }
 0x296   :  { %5621 = vmatprep.subr.bf16.mxu1 %v6484_v29  ;;  %v6518_v29 = vld [vmem:[#allocation10 + $0x874] ss:$12 sps:$4 sm:$0xff]  }
 0x297   :  { %4576 = vmatpush1.bf16.msra.mxu0 %v6443_v30  ;;  %v6516_v30 = vld [vmem:[#allocation10 + $0x870] ss:$12 sps:$4 sm:$0xff]  }
 0x298   :  { %4577 = vmatprep.subr.bf16.mxu0 %v6448_v31  ;;  %v6521_v31 = vld [vmem:[#allocation10 + $0x88c] ss:$12 sps:$4 sm:$0xff]  }
 0x299   :  { %5622 = vmatpush3.bf16.msra.mxu1 %v6485_v32  ;;  %v6519_v32 = vld [vmem:[#allocation10 + $0x888] ss:$12 sps:$4 sm:$0xff]  }
 0x29b   :  { %4578 = vmatpush1.bf16.msra.mxu0 %v6446_v33  ;;  %v6524_v33 = vld [vmem:[#allocation10 + $0x8a4] ss:$12 sps:$4 sm:$0xff]  }
 0x29c   :  { %4579 = vmatprep.subr.bf16.mxu0 %v6453_v35  ;;  %v6522_v35 = vld [vmem:[#allocation10 + $0x8a0] ss:$12 sps:$4 sm:$0xff]  }
 0x29f   :  { %4580 = vmatpush1.bf16.msra.mxu0 %v6451_v36  ;;  %v6527_v36 = vld [vmem:[#allocation10 + $0x8bc] ss:$12 sps:$4 sm:$0xff]  }
 0x2a0   :  { %4581 = vmatprep.subr.bf16.mxu0 %v6458_v37  ;;  %v2836_v37 = vld [vmem:[#allocation12] sm:$0x7] }
 0x2a3   :  { %4582 = vmatpush1.bf16.msra.mxu0 %v6456_v28  ;;  %v6525_v28 = vld [vmem:[#allocation10 + $0x8b8] ss:$12 sps:$4 sm:$0xff]  }
 0x2a4   :  { %4583 = vmatprep.subr.bf16.mxu0 %v6463_v38  ;;  %v6530_v38 = vld [vmem:[#allocation10 + $0x8d4] ss:$12 sps:$4 sm:$0xff]  }
 0x2a7   :  { %4584 = vmatpush1.bf16.msra.mxu0 %v6461_v39  ;;  %v2849_v39 = vrot.slane %v2836_v37, %v6852_v42 }
 0x2a8   :  { %4585 = vmatprep.subr.bf16.mxu0 %v6468_v41 }
 0x2ab   :  { %4586 = vmatpush1.bf16.msra.mxu0 %v6466_v45  ;;  %v6528_v45 = vld [vmem:[#allocation10 + $0x8d0] ss:$12 sps:$4 sm:$0xff]  }
 0x2ac   :  { %4587 = vmatprep.subr.bf16.mxu0 %v6473_v18 }
 0x2af   :  { %4588 = vmatpush1.bf16.msra.mxu0 %v6471_v46  ;;  %v2407_v53 = vpop.f32.mrb[12].mxu1  ;;  %v6533_v46 = vld [vmem:[#allocation10 + $0x8ec] ss:$12 sps:$4 sm:$0xff]  }
 0x2b0   :  { %v5649_v55 = vadd.f32 %v2407_v53, %v427_v49  ;;  %v2409_v56 = vpop.f32.mrb[13].mxu1  ;;  %4589 = vmatprep.subr.bf16.mxu0 %v6478_v52 }
 0x2b1   :  { %v5650_v59 = vadd.f32 %v2409_v56, %v431_v48  ;;  %v2411_v60 = vpop.f32.mrb[14].mxu1 }
 0x2b2   :  { %v2426_v61 = vmax.f32 %v5649_v55, 0.0  ;;  %v5651_v62 = vadd.f32 %v2411_v60, %v427_v49  ;;  %v2413_v0 = vpop.f32.mrb[15].mxu1 }
 0x2b3   :  { %v2427_v1 = vmax.f32 %v5650_v59, 0.0  ;;  %v5652_v2 = vadd.f32 %v2413_v0, %v431_v48  ;;  %4590 = vmatpush1.bf16.msra.mxu0 %v6476_v54 }
 0x2b4   :  { %v2438_v43 = vmax.f32 %v5651_v62, 0.0  ;;  %4591 = vmatprep.subr.bf16.mxu0 %v6483_v58  ;;  %v6531_v58 = vld [vmem:[#allocation10 + $0x8e8] ss:$12 sps:$4 sm:$0xff]  }
 0x2b5   :  { %v2439_v34 = vmax.f32 %v5652_v2, 0.0 }
 0x2b6   :  { %v6893_v16 = vpack.c.bf16 %v2438_v43, %v2426_v61 }
 0x2b7   :  { %v2451_v5 = vpack.c.bf16 %v2439_v34, %v2427_v1  ;;  %4592 = vmatpush1.bf16.msra.mxu0 %v6481_v3 }
 0x2b8   :  { %4604 = vmatprep.subr.bf16.mxu0 %v6488_v40 }
 0x2b9   :  { %4884 = vmatprep.mubr.bf16.mxu1 %v2451_v5 }
 0x2ba   :  { %4594 = vmatmul.mubr.bf16.vlgmr.msra.gmra.mrb[8].mxu0 %v6871_v47  ;;  %4885 = vmatmul.mubr.bf16.vlgmr.msra.gmra.mrb[36].mxu1 %v6893_v16  ;;  %v6501_v47 = vld [vmem:[#allocation10 + $0x7f8] ss:$12 sps:$4 sm:$0xff]  }
 0x2bb   :  { %4605 = vmatpush1.bf16.msra.mxu0 %v6486_v8  ;;  %4636 = vmatprep.mubr.bf16.mxu0 %v2451_v5 }
 0x2bc   :  { %4606 = vmatprep.subr.bf16.mxu0 %v6491_v9 }
 0x2bf   :  { %4607 = vmatpush1.bf16.msra.mxu0 %v6489_v10 }
 0x2c0   :  { %4608 = vmatprep.subr.bf16.mxu0 %v6494_v11 }
 0x2c3   :  { %4609 = vmatpush1.bf16.msra.mxu0 %v6492_v12 }
 0x2c4   :  { %4610 = vmatprep.subr.bf16.mxu0 %v6497_v13 }
 0x2c7   :  { %4611 = vmatpush1.bf16.msra.mxu0 %v6495_v14 }
 0x2c8   :  { %4612 = vmatprep.subr.bf16.mxu0 %v6500_v4 }
 0x2cb   :  { %4613 = vmatpush1.bf16.msra.mxu0 %v6498_v7 }
 0x2cc   :  { %4614 = vmatprep.subr.bf16.mxu0 %v6503_v15 }
 0x2cf   :  { %4615 = vmatpush1.bf16.msra.mxu0 %v6501_v47  ;;  %v5513_v51 = vpop.f32.mrb[16].mxu1 }
 0x2d0   :  { %v5514_v17 = vpop.f32.mrb[17].mxu1  ;;  %4616 = vmatprep.subr.bf16.mxu0 %v6506_v50 }
 0x2d1   :  { %v5515_v20 = vadd.f32 %v5514_v17, %v5513_v51  ;;  %v5516_v57 = vpop.f32.mrb[18].mxu1 }
 0x2d2   :  { %v5517_v21 = vpop.f32.mrb[19].mxu1 }
 0x2d3   :  { %4617 = vmatpush1.bf16.msra.mxu0 %v6504_v63  ;;  %v5518_v22 = vadd.f32 %v5517_v21, %v5516_v57  ;;  %v4682_v49 = vadd.f32 %v5515_v20, %v2849_v39 }
 0x2d4   :  { %4618 = vmatprep.subr.bf16.mxu0 %v6509_v19 }
 0x2d5   :  { %v4685_v54 = vadd.f32 %v5518_v22, %v2849_v39  ;;  %v2841_v22 = vrot.slane %v2836_v37, %v6824_v44 }
 0x2d7   :  { %4619 = vmatpush1.bf16.msra.mxu0 %v6507_v23  ;;  %v2845_v23 = vrot.slane %v2836_v37, %v6827_v6 }
 0x2d8   :  { %4620 = vmatprep.subr.bf16.mxu0 %v6512_v24 }
 0x2db   :  { %4621 = vmatpush1.bf16.msra.mxu0 %v6510_v25 }
 0x2dc   :  { %4622 = vmatprep.subr.bf16.mxu0 %v6515_v26 }
 0x2df   :  { %4623 = vmatpush1.bf16.msra.mxu0 %v6513_v27 }
 0x2e0   :  { %4624 = vmatprep.subr.bf16.mxu0 %v6518_v29 }
 0x2e3   :  { %4625 = vmatpush1.bf16.msra.mxu0 %v6516_v30 }
 0x2e4   :  { %4626 = vmatprep.subr.bf16.mxu0 %v6521_v31 }
 0x2e7   :  { %4627 = vmatpush1.bf16.msra.mxu0 %v6519_v32 }
 0x2e8   :  { %4628 = vmatprep.subr.bf16.mxu0 %v6524_v33 }
 0x2eb   :  { %4629 = vmatpush1.bf16.msra.mxu0 %v6522_v35 }
 0x2ec   :  { %4630 = vmatprep.subr.bf16.mxu0 %v6527_v36 }
 0x2ef   :  { %4631 = vmatpush1.bf16.msra.mxu0 %v6525_v28  ;;  %v5535_v41 = vpop.f32.mrb[20].mxu1 }
 0x2f0   :  { %v5536_v18 = vpop.f32.mrb[21].mxu1  ;;  %4632 = vmatprep.subr.bf16.mxu0 %v6530_v38 }
 0x2f1   :  { %v5537_v52 = vadd.f32 %v5536_v18, %v5535_v41  ;;  %v5538_v48 = vpop.f32.mrb[22].mxu1 }
 0x2f2   :  { %v5539_v53 = vpop.f32.mrb[23].mxu1 }
 0x2f3   :  { %v4723_v55 = vadd.f32 %v5537_v52, %v4682_v49  ;;  %4633 = vmatpush1.bf16.msra.mxu0 %v6528_v45  ;;  %v5540_v56 = vadd.f32 %v5539_v53, %v5538_v48 }
 0x2f4   :  { %4634 = vmatprep.subr.bf16.mxu0 %v6533_v46 }
 0x2f5   :  { %v4726_v59 = vadd.f32 %v5540_v56, %v4685_v54 }
 0x2f7   :  { %4635 = vmatpush1.bf16.msra.mxu0 %v6531_v58 }
 0x2fa   :  { %4637 = vmatmul.mubr.bf16.vlgmr.msra.gmra.mrb[8].mxu0 %v6893_v16 }
 0x30f   :  { %v5557_v42 = vpop.f32.mrb[24].mxu1 }
 0x310   :  { %v5558_v60 = vpop.f32.mrb[25].mxu1 }
 0x311   :  { %v5559_v61 = vadd.f32 %v5558_v60, %v5557_v42  ;;  %v5560_v62 = vpop.f32.mrb[26].mxu1 }
 0x312   :  { %v5561_v0 = vpop.f32.mrb[27].mxu1 }
 0x313   :  { %v4764_v1 = vadd.f32 %v5559_v61, %v4723_v55  ;;  %v5562_v2 = vadd.f32 %v5561_v0, %v5560_v62 }
 0x315   :  { %v4767_v3 = vadd.f32 %v5562_v2, %v4726_v59 }
 0x32f   :  { %v5579_v43 = vpop.f32.mrb[28].mxu1 }
 0x330   :  { %v5580_v40 = vpop.f32.mrb[29].mxu1 }
 0x331   :  { %v5581_v34 = vadd.f32 %v5580_v40, %v5579_v43  ;;  %v5582_v5 = vpop.f32.mrb[30].mxu1 }
 0x332   :  { %v5583_v8 = vpop.f32.mrb[31].mxu1 }
 0x333   :  { %v4805_v9 = vadd.f32 %v5581_v34, %v4764_v1  ;;  %v5584_v10 = vadd.f32 %v5583_v8, %v5582_v5 }
 0x335   :  { %v4808_v11 = vadd.f32 %v5584_v10, %v4767_v3 }
 0x34f   :  { %v5601_v12 = vpop.f32.mrb[32].mxu1 }
 0x350   :  { %v5602_v13 = vpop.f32.mrb[33].mxu1 }
 0x351   :  { %v5603_v14 = vadd.f32 %v5602_v13, %v5601_v12  ;;  %v5604_v16 = vpop.f32.mrb[34].mxu1 }
 0x352   :  { %v5605_v4 = vpop.f32.mrb[35].mxu1 }
 0x353   :  { %v4846_v7 = vadd.f32 %v5603_v14, %v4805_v9  ;;  %v5606_v15 = vadd.f32 %v5605_v4, %v5604_v16 }
 0x355   :  { %v4849_v47 = vadd.f32 %v5606_v15, %v4808_v11 }
 0x38d   :  { %v5623_v50 = vpop.f32.mrb[36].mxu1 }
 0x38e   :  { %v5624_v51 = vpop.f32.mrb[37].mxu1 }
 0x38f   :  { %v5625_v63 = vadd.f32 %v5624_v51, %v5623_v50  ;;  %v5626_v17 = vpop.f32.mrb[38].mxu1 }
 0x390   :  { %v5627_v19 = vpop.f32.mrb[39].mxu1 }
 0x391   :  { %v4887_v20 = vadd.f32 %v5625_v63, %v4846_v7  ;;  %v5628_v57 = vadd.f32 %v5627_v19, %v5626_v17 }
 0x393   :  { %4895 = vst [vmem:[#allocation13 + $0x10] sm:$0xff] %v4887_v20  ;;  %v4890_v21 = vadd.f32 %v5628_v57, %v4849_v47 }
 0x395   :  { %4898 = vst [vmem:[#allocation13 + $0x28] sm:$0xff] %v4890_v21 }
 0x3cd   :  { %v4638_v24 = vpop.f32.mrb[8].mxu0 }
 0x3ce   :  { %v5653_v25 = vadd.f32 %v4638_v24, %v2841_v22  ;;  %v4640_v26 = vpop.f32.mrb[9].mxu0 }
 0x3cf   :  { %v5654_v27 = vadd.f32 %v4640_v26, %v2845_v23  ;;  %v4642_v29 = vpop.f32.mrb[10].mxu0 }
 0x3d0   :  { %4893 = vst [vmem:[#allocation13] sm:$0xff] %v5653_v25  ;;  %v5655_v30 = vadd.f32 %v4642_v29, %v2841_v22  ;;  %v4644_v31 = vpop.f32.mrb[11].mxu0 }
 0x3d1   :  { %4894 = vst [vmem:[#allocation13 + $0x8] sm:$0xff] %v5654_v27  ;;  %v5656_v32 = vadd.f32 %v4644_v31, %v2845_v23 }
 0x3d2   :  { %4896 = vst [vmem:[#allocation13 + $0x18] sm:$0xff] %v5655_v30 }
 0x3d3   :  { %4897 = vst [vmem:[#allocation13 + $0x20] sm:$0xff] %v5656_v32 }
 0x3d4   :  { %6659 = shalt.err (!%p6656_p2)
}
 0x3d5   :  { %s6660_s9 = scalar_lea.hbm %s6919_s6, 768 }
 0x3d6   :  { %p6661_p3 = scmp.ne.s32.totalorder %s6919_s6, %s6660_s9  ;;  %p6664_p4 = scmp.lt.u32.totalorder %s6660_s9, %s6919_s6 }
 0x3d8   :  { %p6666_p5 = pnand %p6664_p4, %p6661_p3 }
 0x3da   :  { %6669 = shalt.err (!%p6666_p5)
}
 0x3db   :  { %s6689_s15 = smov 384   ;;  %s6690_s16 = smov 24  }
 0x3dc   :  { %4910 = dma.vmem_to_hbm [thread:$0]  %s4905_s30, 768, %s6919_s6, [#allocation6], %s6689_s15, %s6689_s15, %s6690_s16  }
 0x3dd   :  { %6676 = dma.done.wait [#allocation6], 768  }
 0x3de   :  { %6677 = vsyncadd [#allocation6], 4294966528 }
 0x3df   :  { %4914 = vsyncpa [#allocation5], 1 }
 0x3e0   :  { %4915 = vsyncpa [#allocation8], 1 }
 0x3e1   :  { %4916 = vsyncpa [#allocation11], 1 }
 0x3e2   :  { %4917 = vsyncpa [#allocation6], 1 }

</bundles_post_ra>
